<compile_context>
chip_gen: v7x
topology: tpu7x:2x2x1
jax: 0.10.0
libtpu: 0.0.40
codegen_flags: <defaults>
</compile_context>

<pallas_src>
import functools

import jax
import jax.numpy as jnp
import numpy as np
from jax.experimental import pallas as pl
from jax.experimental.pallas import tpu as pltpu


# ------------------------------ Pallas kernel -------------------------------

def _fused_encoder_kernel(x_ref, w1_ref, b1_ref, w2_ref, b2_ref, w3_ref,
                          b3_ref, o_ref, pad1_ref, pad2_ref, pad3_ref,
                          *, BB, T):
    """One batch block: conv1+ReLU -> conv2+ReLU -> conv3+ReLU -> mean over T.

    x_ref  : (BB, T, 3)           input block, channels-last
    wN_ref : (K, Cin, Cout)       conv weights (resident; constant index map)
    bN_ref : (1, Cout)            bias
    o_ref  : (BB, 256)            pooled output (lane-dense, 256 = 2*128)
    padN_ref: VMEM scratch (BB, T + K - 1, Cin) for in-kernel zero padding.
    """

    def conv_relu(h, hp_ref, w_ref, b_ref):
        K = w_ref.shape[0]
        P = (K - 1) // 2
        cin = w_ref.shape[1]
        cout = w_ref.shape[2]
        # In-kernel "same" padding: zero the scratch, drop h into the interior.
        hp_ref[...] = jnp.zeros_like(hp_ref)
        hp_ref[:, P:P + T, :] = h                         # (BB, T, Cin) interior
        # Per-tap matmuls over the whole batch block at once: BB*T rows fill
        # the MXU row tile (vs. T rows when looping per element).
        acc = jnp.zeros((BB * T, cout), jnp.float32)
        for k in range(K):                                # static unroll over taps
            lhs = hp_ref[:, k:k + T, :].reshape(BB * T, cin)
            acc = acc + jnp.dot(lhs, w_ref[k],
                                preferred_element_type=jnp.float32)
        acc = jnp.maximum(acc + b_ref[...], 0.0)          # bias broadcast + ReLU
        return acc.reshape(BB, T, cout)

    h = x_ref[...]                                        # (BB, T, 3)
    h = conv_relu(h, pad1_ref, w1_ref, b1_ref)            # (BB, T, 64)   VMEM-only
    h = conv_relu(h, pad2_ref, w2_ref, b2_ref)            # (BB, T, 128)  VMEM-only
    h = conv_relu(h, pad3_ref, w3_ref, b3_ref)            # (BB, T, 256)  VMEM-only
    # Fused temporal-mean epilogue; single lane-dense (BB, 256) store.
    o_ref[...] = jnp.sum(h, axis=1) * (1.0 / T)


# -------------------------------- Wrapper ------------------------------------

def video_encoder_forward(x_ncl, params, *, batch_block=None):
    """x_ncl: (B, 3, T) float32 (PyTorch NCL layout).  Returns (B, 256)."""
    x = jnp.transpose(x_ncl, (0, 2, 1))                   # (B, T, 3) channels-last
    B, T, cin = x.shape
    w1, b1 = params["w1"], params["b1"].reshape(1, -1)
    w2, b2 = params["w2"], params["b2"].reshape(1, -1)
    w3, b3 = params["w3"], params["b3"].reshape(1, -1)
    k1, _, c1 = w1.shape
    k2, _, c2 = w2.shape
    k3, _, c3 = w3.shape

    # Batch-block size: aim for ~128 MXU rows per tap matmul, capped at B.
    if batch_block is None:
        batch_block = max(1, min(B, max(1, 128 // T)))
    BB = int(batch_block)
    grid = (pl.cdiv(B, BB),)                              # ragged tail handled by
                                                          # Pallas block padding
    kernel = functools.partial(_fused_encoder_kernel, BB=BB, T=T)
    out = pl.pallas_call(
        kernel,
        out_shape=jax.ShapeDtypeStruct((B, c3), jnp.float32),
        grid_spec=pltpu.PrefetchScalarGridSpec(
            num_scalar_prefetch=0,
            grid=grid,                                    # one batch block / step
            in_specs=[
                pl.BlockSpec((BB, T, cin), lambda i: (i, 0, 0)),
                # Weights / biases: constant index maps -> fetched once, resident.
                pl.BlockSpec(w1.shape, lambda i: (0, 0, 0)),
                pl.BlockSpec((1, c1), lambda i: (0, 0)),
                pl.BlockSpec(w2.shape, lambda i: (0, 0, 0)),
                pl.BlockSpec((1, c2), lambda i: (0, 0)),
                pl.BlockSpec(w3.shape, lambda i: (0, 0, 0)),
                pl.BlockSpec((1, c3), lambda i: (0, 0)),
            ],
            out_specs=pl.BlockSpec((BB, c3), lambda i: (i, 0)),
            scratch_shapes=[
                pltpu.VMEM((BB, T + k1 - 1, cin), jnp.float32),  # padded layer-1 act
                pltpu.VMEM((BB, T + k2 - 1, c1), jnp.float32),   # padded layer-2 act
                pltpu.VMEM((BB, T + k3 - 1, c2), jnp.float32),   # padded layer-3 act
            ],
        ),
        compiler_params=pltpu.CompilerParams(
            dimension_semantics=("parallel",)),           # blocks across cores (v7x)
    )(x, w1, b1, w2, b2, w3, b3)
    return out                                            # (B, 256)


# -------------------------- Parameter initialization -------------------------

def init_params(key):
    """Deterministic init; weights stored as (K, Cin, Cout), bias (Cout,)."""
    def conv_init(k, K, cin, cout):
        kw, kb = jax.random.split(k)
        scale = 1.0 / np.sqrt(cin * K)
        w = jax.random.uniform(kw, (K, cin, cout), jnp.float32, -scale, scale)
        b = jax.random.uniform(kb, (cout,), jnp.float32, -scale, scale)
        return w, b

    k1, k2, k3 = jax.random.split(key, 3)
    w1, b1 = conv_init(k1, 3, 3, 64)
    w2, b2 = conv_init(k2, 5, 64, 128)
    w3, b3 = conv_init(k3, 7, 128, 256)
    return dict(w1=w1, b1=b1, w2=w2, b2=b2, w3=w3, b3=b3)


# -------------------------------- Reference ----------------------------------

def ref_forward(x_ncl, params):
    """Pure-JAX reference mirroring the PyTorch forward."""
    def conv(x, w, b, pad):
        wt = jnp.transpose(w, (2, 1, 0))                  # (Cout, Cin, K)
        y = jax.lax.conv_general_dilated(
            x, wt, window_strides=(1,), padding=[(pad, pad)],
            dimension_numbers=("NCH", "OIH", "NCH"))
        return jnp.maximum(y + b[None, :, None], 0.0)

    x = conv(x_ncl, params["w1"], params["b1"], 1)
    x = conv(x, params["w2"], params["b2"], 2)
    x = conv(x, params["w3"], params["b3"], 3)
    return x.mean(axis=2)


# ---------------------------------- Main --------------------------------------

if __name__ == "__main__":
    key = jax.random.PRNGKey(0)
    kp, kx = jax.random.split(key)

    params = init_params(kp)

    B, C_in, T = 2, 3, 16
    x = jax.random.normal(kx, (B, C_in, T), jnp.float32)  # PyTorch NCL layout

    out = jax.jit(video_encoder_forward)(x, params)
    out = jax.block_until_ready(out)

    ref = ref_forward(x, params)
    np.testing.assert_allclose(np.asarray(out), np.asarray(ref),
                               rtol=1e-2, atol=1e-2)
    assert out.shape == (B, 256) and out.dtype == jnp.float32

    print("KERNEL_OK")
</pallas_src>

<mosaic_0001>
module attributes {stable_mosaic.version = 11 : i64} {
  func.func @_fused_encoder_kernel(%arg0: i32, %arg1: memref<2x16x3xf32, #tpu.memory_space<vmem>>, %arg2: memref<3x3x64xf32, #tpu.memory_space<vmem>>, %arg3: memref<1x64xf32, #tpu.memory_space<vmem>>, %arg4: memref<5x64x128xf32, #tpu.memory_space<vmem>>, %arg5: memref<1x128xf32, #tpu.memory_space<vmem>>, %arg6: memref<7x128x256xf32, #tpu.memory_space<vmem>>, %arg7: memref<1x256xf32, #tpu.memory_space<vmem>>, %arg8: memref<2x256xf32, #tpu.memory_space<vmem>>, %arg9: memref<2x18x3xf32, #tpu.memory_space<vmem>>, %arg10: memref<2x20x64xf32, #tpu.memory_space<vmem>>, %arg11: memref<2x22x128xf32, #tpu.memory_space<vmem>>) attributes {dimension_semantics = [#tpu.dimension_semantics<parallel>], iteration_bounds = array<i64: 1>, scalar_prefetch = 0 : i64, scratch_operands = 3 : i64, tpu.core_type = #tpu.core_type<tc>, window_params = [{transform_indices = @transform_0, window_bounds = array<i64: 2, 16, 3>}, {pipeline_mode = #tpu.pipeline_mode<synchronous>, transform_indices = @transform_1, window_bounds = array<i64: 3, 3, 64>}, {pipeline_mode = #tpu.pipeline_mode<synchronous>, transform_indices = @transform_2, window_bounds = array<i64: 1, 64>}, {pipeline_mode = #tpu.pipeline_mode<synchronous>, transform_indices = @transform_3, window_bounds = array<i64: 5, 64, 128>}, {pipeline_mode = #tpu.pipeline_mode<synchronous>, transform_indices = @transform_4, window_bounds = array<i64: 1, 128>}, {pipeline_mode = #tpu.pipeline_mode<synchronous>, transform_indices = @transform_5, window_bounds = array<i64: 7, 128, 256>}, {pipeline_mode = #tpu.pipeline_mode<synchronous>, transform_indices = @transform_6, window_bounds = array<i64: 1, 256>}, {transform_indices = @transform_7, window_bounds = array<i64: 2, 256>}]} {
    %c0 = arith.constant 0 : index
    %c0_0 = arith.constant 0 : index
    %c0_1 = arith.constant 0 : index
    %0 = vector.load %arg1[%c0, %c0_0, %c0_1] : memref<2x16x3xf32, #tpu.memory_space<vmem>>, vector<2x16x3xf32>
    %cst = arith.constant 0.000000e+00 : f32
    %1 = vector.broadcast %cst : f32 to vector<2x18x3xf32>
    %c0_2 = arith.constant 0 : index
    %c0_3 = arith.constant 0 : index
    %c0_4 = arith.constant 0 : index
    %2 = vector.load %arg9[%c0_2, %c0_3, %c0_4] : memref<2x18x3xf32, #tpu.memory_space<vmem>>, vector<2x18x3xf32>
    tpu.vector_store %arg9[%c0_2, %c0_3, %c0_4], %1 {strides = array<i32>} : memref<2x18x3xf32, #tpu.memory_space<vmem>>, vector<2x18x3xf32>,
    %c0_5 = arith.constant 0 : index
    %c1 = arith.constant 1 : index
    %c0_6 = arith.constant 0 : index
    %3 = vector.load %arg9[%c0_5, %c1, %c0_6] : memref<2x18x3xf32, #tpu.memory_space<vmem>>, vector<2x16x3xf32>
    tpu.vector_store %arg9[%c0_5, %c1, %c0_6], %0 {strides = array<i32>} : memref<2x18x3xf32, #tpu.memory_space<vmem>>, vector<2x16x3xf32>,
    %cst_7 = arith.constant 0.000000e+00 : f32
    %4 = vector.broadcast %cst_7 : f32 to vector<32x64xf32>
    %c0_8 = arith.constant 0 : index
    %c0_9 = arith.constant 0 : index
    %c0_10 = arith.constant 0 : index
    %5 = vector.load %arg9[%c0_8, %c0_9, %c0_10] : memref<2x18x3xf32, #tpu.memory_space<vmem>>, vector<2x16x3xf32>
    %6 = vector.shape_cast %5 : vector<2x16x3xf32> to vector<32x3xf32>
    %c0_11 = arith.constant 0 : index
    %c0_12 = arith.constant 0 : index
    %c0_13 = arith.constant 0 : index
    %7 = vector.load %arg2[%c0_11, %c0_12, %c0_13] : memref<3x3x64xf32, #tpu.memory_space<vmem>>, vector<1x3x64xf32>
    %8 = vector.shape_cast %7 : vector<1x3x64xf32> to vector<3x64xf32>
    %cst_14 = arith.constant dense<0.000000e+00> : vector<32x64xf32>
    %9 = tpu.matmul %6, %8, %cst_14 {dimension_numbers = #tpu.dot_dimension_numbers<[1], [0], [0], [1], [0, 0, 1, 1], [], []>} : vector<32x3xf32>, vector<3x64xf32>, vector<32x64xf32> -> vector<32x64xf32>
    %10 = arith.addf %4, %9 : vector<32x64xf32>
    %c0_15 = arith.constant 0 : index
    %c1_16 = arith.constant 1 : index
    %c0_17 = arith.constant 0 : index
    %11 = vector.load %arg9[%c0_15, %c1_16, %c0_17] : memref<2x18x3xf32, #tpu.memory_space<vmem>>, vector<2x16x3xf32>
    %12 = vector.shape_cast %11 : vector<2x16x3xf32> to vector<32x3xf32>
    %c1_18 = arith.constant 1 : index
    %c0_19 = arith.constant 0 : index
    %c0_20 = arith.constant 0 : index
    %13 = vector.load %arg2[%c1_18, %c0_19, %c0_20] : memref<3x3x64xf32, #tpu.memory_space<vmem>>, vector<1x3x64xf32>
    %14 = vector.shape_cast %13 : vector<1x3x64xf32> to vector<3x64xf32>
    %cst_21 = arith.constant dense<0.000000e+00> : vector<32x64xf32>
    %15 = tpu.matmul %12, %14, %cst_21 {dimension_numbers = #tpu.dot_dimension_numbers<[1], [0], [0], [1], [0, 0, 1, 1], [], []>} : vector<32x3xf32>, vector<3x64xf32>, vector<32x64xf32> -> vector<32x64xf32>
    %16 = arith.addf %10, %15 : vector<32x64xf32>
    %c0_22 = arith.constant 0 : index
    %c2 = arith.constant 2 : index
    %c0_23 = arith.constant 0 : index
    %17 = vector.load %arg9[%c0_22, %c2, %c0_23] : memref<2x18x3xf32, #tpu.memory_space<vmem>>, vector<2x16x3xf32>
    %18 = vector.shape_cast %17 : vector<2x16x3xf32> to vector<32x3xf32>
    %c2_24 = arith.constant 2 : index
    %c0_25 = arith.constant 0 : index
    %c0_26 = arith.constant 0 : index
    %19 = vector.load %arg2[%c2_24, %c0_25, %c0_26] : memref<3x3x64xf32, #tpu.memory_space<vmem>>, vector<1x3x64xf32>
    %20 = vector.shape_cast %19 : vector<1x3x64xf32> to vector<3x64xf32>
    %cst_27 = arith.constant dense<0.000000e+00> : vector<32x64xf32>
    %21 = tpu.matmul %18, %20, %cst_27 {dimension_numbers = #tpu.dot_dimension_numbers<[1], [0], [0], [1], [0, 0, 1, 1], [], []>} : vector<32x3xf32>, vector<3x64xf32>, vector<32x64xf32> -> vector<32x64xf32>
    %22 = arith.addf %16, %21 : vector<32x64xf32>
    %c0_28 = arith.constant 0 : index
    %c0_29 = arith.constant 0 : index
    %23 = vector.load %arg3[%c0_28, %c0_29] : memref<1x64xf32, #tpu.memory_space<vmem>>, vector<1x64xf32>
    %24 = vector.broadcast %23 : vector<1x64xf32> to vector<32x64xf32>
    %25 = arith.addf %22, %24 : vector<32x64xf32>
    %cst_30 = arith.constant 0.000000e+00 : f32
    %26 = vector.broadcast %cst_30 : f32 to vector<32x64xf32>
    %27 = arith.maximumf %25, %26 : vector<32x64xf32>
    %28 = vector.shape_cast %27 : vector<32x64xf32> to vector<2x16x64xf32>
    %cst_31 = arith.constant 0.000000e+00 : f32
    %29 = vector.broadcast %cst_31 : f32 to vector<2x20x64xf32>
    %c0_32 = arith.constant 0 : index
    %c0_33 = arith.constant 0 : index
    %c0_34 = arith.constant 0 : index
    %30 = vector.load %arg10[%c0_32, %c0_33, %c0_34] : memref<2x20x64xf32, #tpu.memory_space<vmem>>, vector<2x20x64xf32>
    tpu.vector_store %arg10[%c0_32, %c0_33, %c0_34], %29 {strides = array<i32>} : memref<2x20x64xf32, #tpu.memory_space<vmem>>, vector<2x20x64xf32>,
    %c0_35 = arith.constant 0 : index
    %c2_36 = arith.constant 2 : index
    %c0_37 = arith.constant 0 : index
    %31 = vector.load %arg10[%c0_35, %c2_36, %c0_37] : memref<2x20x64xf32, #tpu.memory_space<vmem>>, vector<2x16x64xf32>
    tpu.vector_store %arg10[%c0_35, %c2_36, %c0_37], %28 {strides = array<i32>} : memref<2x20x64xf32, #tpu.memory_space<vmem>>, vector<2x16x64xf32>,
    %cst_38 = arith.constant 0.000000e+00 : f32
    %32 = vector.broadcast %cst_38 : f32 to vector<32x128xf32>
    %c0_39 = arith.constant 0 : index
    %c0_40 = arith.constant 0 : index
    %c0_41 = arith.constant 0 : index
    %33 = vector.load %arg10[%c0_39, %c0_40, %c0_41] : memref<2x20x64xf32, #tpu.memory_space<vmem>>, vector<2x16x64xf32>
    %34 = vector.shape_cast %33 : vector<2x16x64xf32> to vector<32x64xf32>
    %c0_42 = arith.constant 0 : index
    %c0_43 = arith.constant 0 : index
    %c0_44 = arith.constant 0 : index
    %35 = vector.load %arg4[%c0_42, %c0_43, %c0_44] : memref<5x64x128xf32, #tpu.memory_space<vmem>>, vector<1x64x128xf32>
    %36 = vector.shape_cast %35 : vector<1x64x128xf32> to vector<64x128xf32>
    %cst_45 = arith.constant dense<0.000000e+00> : vector<32x128xf32>
    %37 = tpu.matmul %34, %36, %cst_45 {dimension_numbers = #tpu.dot_dimension_numbers<[1], [0], [0], [1], [0, 0, 1, 1], [], []>} : vector<32x64xf32>, vector<64x128xf32>, vector<32x128xf32> -> vector<32x128xf32>
    %38 = arith.addf %32, %37 : vector<32x128xf32>
    %c0_46 = arith.constant 0 : index
    %c1_47 = arith.constant 1 : index
    %c0_48 = arith.constant 0 : index
    %39 = vector.load %arg10[%c0_46, %c1_47, %c0_48] : memref<2x20x64xf32, #tpu.memory_space<vmem>>, vector<2x16x64xf32>
    %40 = vector.shape_cast %39 : vector<2x16x64xf32> to vector<32x64xf32>
    %c1_49 = arith.constant 1 : index
    %c0_50 = arith.constant 0 : index
    %c0_51 = arith.constant 0 : index
    %41 = vector.load %arg4[%c1_49, %c0_50, %c0_51] : memref<5x64x128xf32, #tpu.memory_space<vmem>>, vector<1x64x128xf32>
    %42 = vector.shape_cast %41 : vector<1x64x128xf32> to vector<64x128xf32>
    %cst_52 = arith.constant dense<0.000000e+00> : vector<32x128xf32>
    %43 = tpu.matmul %40, %42, %cst_52 {dimension_numbers = #tpu.dot_dimension_numbers<[1], [0], [0], [1], [0, 0, 1, 1], [], []>} : vector<32x64xf32>, vector<64x128xf32>, vector<32x128xf32> -> vector<32x128xf32>
    %44 = arith.addf %38, %43 : vector<32x128xf32>
    %c0_53 = arith.constant 0 : index
    %c2_54 = arith.constant 2 : index
    %c0_55 = arith.constant 0 : index
    %45 = vector.load %arg10[%c0_53, %c2_54, %c0_55] : memref<2x20x64xf32, #tpu.memory_space<vmem>>, vector<2x16x64xf32>
    %46 = vector.shape_cast %45 : vector<2x16x64xf32> to vector<32x64xf32>
    %c2_56 = arith.constant 2 : index
    %c0_57 = arith.constant 0 : index
    %c0_58 = arith.constant 0 : index
    %47 = vector.load %arg4[%c2_56, %c0_57, %c0_58] : memref<5x64x128xf32, #tpu.memory_space<vmem>>, vector<1x64x128xf32>
    %48 = vector.shape_cast %47 : vector<1x64x128xf32> to vector<64x128xf32>
    %cst_59 = arith.constant dense<0.000000e+00> : vector<32x128xf32>
    %49 = tpu.matmul %46, %48, %cst_59 {dimension_numbers = #tpu.dot_dimension_numbers<[1], [0], [0], [1], [0, 0, 1, 1], [], []>} : vector<32x64xf32>, vector<64x128xf32>, vector<32x128xf32> -> vector<32x128xf32>
    %50 = arith.addf %44, %49 : vector<32x128xf32>
    %c0_60 = arith.constant 0 : index
    %c3 = arith.constant 3 : index
    %c0_61 = arith.constant 0 : index
    %51 = vector.load %arg10[%c0_60, %c3, %c0_61] : memref<2x20x64xf32, #tpu.memory_space<vmem>>, vector<2x16x64xf32>
    %52 = vector.shape_cast %51 : vector<2x16x64xf32> to vector<32x64xf32>
    %c3_62 = arith.constant 3 : index
    %c0_63 = arith.constant 0 : index
    %c0_64 = arith.constant 0 : index
    %53 = vector.load %arg4[%c3_62, %c0_63, %c0_64] : memref<5x64x128xf32, #tpu.memory_space<vmem>>, vector<1x64x128xf32>
    %54 = vector.shape_cast %53 : vector<1x64x128xf32> to vector<64x128xf32>
    %cst_65 = arith.constant dense<0.000000e+00> : vector<32x128xf32>
    %55 = tpu.matmul %52, %54, %cst_65 {dimension_numbers = #tpu.dot_dimension_numbers<[1], [0], [0], [1], [0, 0, 1, 1], [], []>} : vector<32x64xf32>, vector<64x128xf32>, vector<32x128xf32> -> vector<32x128xf32>
    %56 = arith.addf %50, %55 : vector<32x128xf32>
    %c0_66 = arith.constant 0 : index
    %c4 = arith.constant 4 : index
    %c0_67 = arith.constant 0 : index
    %57 = vector.load %arg10[%c0_66, %c4, %c0_67] : memref<2x20x64xf32, #tpu.memory_space<vmem>>, vector<2x16x64xf32>
    %58 = vector.shape_cast %57 : vector<2x16x64xf32> to vector<32x64xf32>
    %c4_68 = arith.constant 4 : index
    %c0_69 = arith.constant 0 : index
    %c0_70 = arith.constant 0 : index
    %59 = vector.load %arg4[%c4_68, %c0_69, %c0_70] : memref<5x64x128xf32, #tpu.memory_space<vmem>>, vector<1x64x128xf32>
    %60 = vector.shape_cast %59 : vector<1x64x128xf32> to vector<64x128xf32>
    %cst_71 = arith.constant dense<0.000000e+00> : vector<32x128xf32>
    %61 = tpu.matmul %58, %60, %cst_71 {dimension_numbers = #tpu.dot_dimension_numbers<[1], [0], [0], [1], [0, 0, 1, 1], [], []>} : vector<32x64xf32>, vector<64x128xf32>, vector<32x128xf32> -> vector<32x128xf32>
    %62 = arith.addf %56, %61 : vector<32x128xf32>
    %c0_72 = arith.constant 0 : index
    %c0_73 = arith.constant 0 : index
    %63 = vector.load %arg5[%c0_72, %c0_73] : memref<1x128xf32, #tpu.memory_space<vmem>>, vector<1x128xf32>
    %64 = vector.broadcast %63 : vector<1x128xf32> to vector<32x128xf32>
    %65 = arith.addf %62, %64 : vector<32x128xf32>
    %cst_74 = arith.constant 0.000000e+00 : f32
    %66 = vector.broadcast %cst_74 : f32 to vector<32x128xf32>
    %67 = arith.maximumf %65, %66 : vector<32x128xf32>
    %68 = vector.shape_cast %67 : vector<32x128xf32> to vector<2x16x128xf32>
    %cst_75 = arith.constant 0.000000e+00 : f32
    %69 = vector.broadcast %cst_75 : f32 to vector<2x22x128xf32>
    %c0_76 = arith.constant 0 : index
    %c0_77 = arith.constant 0 : index
    %c0_78 = arith.constant 0 : index
    %70 = vector.load %arg11[%c0_76, %c0_77, %c0_78] : memref<2x22x128xf32, #tpu.memory_space<vmem>>, vector<2x22x128xf32>
    tpu.vector_store %arg11[%c0_76, %c0_77, %c0_78], %69 {strides = array<i32>} : memref<2x22x128xf32, #tpu.memory_space<vmem>>, vector<2x22x128xf32>,
    %c0_79 = arith.constant 0 : index
    %c3_80 = arith.constant 3 : index
    %c0_81 = arith.constant 0 : index
    %71 = vector.load %arg11[%c0_79, %c3_80, %c0_81] : memref<2x22x128xf32, #tpu.memory_space<vmem>>, vector<2x16x128xf32>
    tpu.vector_store %arg11[%c0_79, %c3_80, %c0_81], %68 {strides = array<i32>} : memref<2x22x128xf32, #tpu.memory_space<vmem>>, vector<2x16x128xf32>,
    %cst_82 = arith.constant 0.000000e+00 : f32
    %72 = vector.broadcast %cst_82 : f32 to vector<32x256xf32>
    %c0_83 = arith.constant 0 : index
    %c0_84 = arith.constant 0 : index
    %c0_85 = arith.constant 0 : index
    %73 = vector.load %arg11[%c0_83, %c0_84, %c0_85] : memref<2x22x128xf32, #tpu.memory_space<vmem>>, vector<2x16x128xf32>
    %74 = vector.shape_cast %73 : vector<2x16x128xf32> to vector<32x128xf32>
    %c0_86 = arith.constant 0 : index
    %c0_87 = arith.constant 0 : index
    %c0_88 = arith.constant 0 : index
    %75 = vector.load %arg6[%c0_86, %c0_87, %c0_88] : memref<7x128x256xf32, #tpu.memory_space<vmem>>, vector<1x128x256xf32>
    %76 = vector.shape_cast %75 : vector<1x128x256xf32> to vector<128x256xf32>
    %cst_89 = arith.constant dense<0.000000e+00> : vector<32x256xf32>
    %77 = tpu.matmul %74, %76, %cst_89 {dimension_numbers = #tpu.dot_dimension_numbers<[1], [0], [0], [1], [0, 0, 1, 1], [], []>} : vector<32x128xf32>, vector<128x256xf32>, vector<32x256xf32> -> vector<32x256xf32>
    %78 = arith.addf %72, %77 : vector<32x256xf32>
    %c0_90 = arith.constant 0 : index
    %c1_91 = arith.constant 1 : index
    %c0_92 = arith.constant 0 : index
    %79 = vector.load %arg11[%c0_90, %c1_91, %c0_92] : memref<2x22x128xf32, #tpu.memory_space<vmem>>, vector<2x16x128xf32>
    %80 = vector.shape_cast %79 : vector<2x16x128xf32> to vector<32x128xf32>
    %c1_93 = arith.constant 1 : index
    %c0_94 = arith.constant 0 : index
    %c0_95 = arith.constant 0 : index
    %81 = vector.load %arg6[%c1_93, %c0_94, %c0_95] : memref<7x128x256xf32, #tpu.memory_space<vmem>>, vector<1x128x256xf32>
    %82 = vector.shape_cast %81 : vector<1x128x256xf32> to vector<128x256xf32>
    %cst_96 = arith.constant dense<0.000000e+00> : vector<32x256xf32>
    %83 = tpu.matmul %80, %82, %cst_96 {dimension_numbers = #tpu.dot_dimension_numbers<[1], [0], [0], [1], [0, 0, 1, 1], [], []>} : vector<32x128xf32>, vector<128x256xf32>, vector<32x256xf32> -> vector<32x256xf32>
    %84 = arith.addf %78, %83 : vector<32x256xf32>
    %c0_97 = arith.constant 0 : index
    %c2_98 = arith.constant 2 : index
    %c0_99 = arith.constant 0 : index
    %85 = vector.load %arg11[%c0_97, %c2_98, %c0_99] : memref<2x22x128xf32, #tpu.memory_space<vmem>>, vector<2x16x128xf32>
    %86 = vector.shape_cast %85 : vector<2x16x128xf32> to vector<32x128xf32>
    %c2_100 = arith.constant 2 : index
    %c0_101 = arith.constant 0 : index
    %c0_102 = arith.constant 0 : index
    %87 = vector.load %arg6[%c2_100, %c0_101, %c0_102] : memref<7x128x256xf32, #tpu.memory_space<vmem>>, vector<1x128x256xf32>
    %88 = vector.shape_cast %87 : vector<1x128x256xf32> to vector<128x256xf32>
    %cst_103 = arith.constant dense<0.000000e+00> : vector<32x256xf32>
    %89 = tpu.matmul %86, %88, %cst_103 {dimension_numbers = #tpu.dot_dimension_numbers<[1], [0], [0], [1], [0, 0, 1, 1], [], []>} : vector<32x128xf32>, vector<128x256xf32>, vector<32x256xf32> -> vector<32x256xf32>
    %90 = arith.addf %84, %89 : vector<32x256xf32>
    %c0_104 = arith.constant 0 : index
    %c3_105 = arith.constant 3 : index
    %c0_106 = arith.constant 0 : index
    %91 = vector.load %arg11[%c0_104, %c3_105, %c0_106] : memref<2x22x128xf32, #tpu.memory_space<vmem>>, vector<2x16x128xf32>
    %92 = vector.shape_cast %91 : vector<2x16x128xf32> to vector<32x128xf32>
    %c3_107 = arith.constant 3 : index
    %c0_108 = arith.constant 0 : index
    %c0_109 = arith.constant 0 : index
    %93 = vector.load %arg6[%c3_107, %c0_108, %c0_109] : memref<7x128x256xf32, #tpu.memory_space<vmem>>, vector<1x128x256xf32>
    %94 = vector.shape_cast %93 : vector<1x128x256xf32> to vector<128x256xf32>
    %cst_110 = arith.constant dense<0.000000e+00> : vector<32x256xf32>
    %95 = tpu.matmul %92, %94, %cst_110 {dimension_numbers = #tpu.dot_dimension_numbers<[1], [0], [0], [1], [0, 0, 1, 1], [], []>} : vector<32x128xf32>, vector<128x256xf32>, vector<32x256xf32> -> vector<32x256xf32>
    %96 = arith.addf %90, %95 : vector<32x256xf32>
    %c0_111 = arith.constant 0 : index
    %c4_112 = arith.constant 4 : index
    %c0_113 = arith.constant 0 : index
    %97 = vector.load %arg11[%c0_111, %c4_112, %c0_113] : memref<2x22x128xf32, #tpu.memory_space<vmem>>, vector<2x16x128xf32>
    %98 = vector.shape_cast %97 : vector<2x16x128xf32> to vector<32x128xf32>
    %c4_114 = arith.constant 4 : index
    %c0_115 = arith.constant 0 : index
    %c0_116 = arith.constant 0 : index
    %99 = vector.load %arg6[%c4_114, %c0_115, %c0_116] : memref<7x128x256xf32, #tpu.memory_space<vmem>>, vector<1x128x256xf32>
    %100 = vector.shape_cast %99 : vector<1x128x256xf32> to vector<128x256xf32>
    %cst_117 = arith.constant dense<0.000000e+00> : vector<32x256xf32>
    %101 = tpu.matmul %98, %100, %cst_117 {dimension_numbers = #tpu.dot_dimension_numbers<[1], [0], [0], [1], [0, 0, 1, 1], [], []>} : vector<32x128xf32>, vector<128x256xf32>, vector<32x256xf32> -> vector<32x256xf32>
    %102 = arith.addf %96, %101 : vector<32x256xf32>
    %c0_118 = arith.constant 0 : index
    %c5 = arith.constant 5 : index
    %c0_119 = arith.constant 0 : index
    %103 = vector.load %arg11[%c0_118, %c5, %c0_119] : memref<2x22x128xf32, #tpu.memory_space<vmem>>, vector<2x16x128xf32>
    %104 = vector.shape_cast %103 : vector<2x16x128xf32> to vector<32x128xf32>
    %c5_120 = arith.constant 5 : index
    %c0_121 = arith.constant 0 : index
    %c0_122 = arith.constant 0 : index
    %105 = vector.load %arg6[%c5_120, %c0_121, %c0_122] : memref<7x128x256xf32, #tpu.memory_space<vmem>>, vector<1x128x256xf32>
    %106 = vector.shape_cast %105 : vector<1x128x256xf32> to vector<128x256xf32>
    %cst_123 = arith.constant dense<0.000000e+00> : vector<32x256xf32>
    %107 = tpu.matmul %104, %106, %cst_123 {dimension_numbers = #tpu.dot_dimension_numbers<[1], [0], [0], [1], [0, 0, 1, 1], [], []>} : vector<32x128xf32>, vector<128x256xf32>, vector<32x256xf32> -> vector<32x256xf32>
    %108 = arith.addf %102, %107 : vector<32x256xf32>
    %c0_124 = arith.constant 0 : index
    %c6 = arith.constant 6 : index
    %c0_125 = arith.constant 0 : index
    %109 = vector.load %arg11[%c0_124, %c6, %c0_125] : memref<2x22x128xf32, #tpu.memory_space<vmem>>, vector<2x16x128xf32>
    %110 = vector.shape_cast %109 : vector<2x16x128xf32> to vector<32x128xf32>
    %c6_126 = arith.constant 6 : index
    %c0_127 = arith.constant 0 : index
    %c0_128 = arith.constant 0 : index
    %111 = vector.load %arg6[%c6_126, %c0_127, %c0_128] : memref<7x128x256xf32, #tpu.memory_space<vmem>>, vector<1x128x256xf32>
    %112 = vector.shape_cast %111 : vector<1x128x256xf32> to vector<128x256xf32>
    %cst_129 = arith.constant dense<0.000000e+00> : vector<32x256xf32>
    %113 = tpu.matmul %110, %112, %cst_129 {dimension_numbers = #tpu.dot_dimension_numbers<[1], [0], [0], [1], [0, 0, 1, 1], [], []>} : vector<32x128xf32>, vector<128x256xf32>, vector<32x256xf32> -> vector<32x256xf32>
    %114 = arith.addf %108, %113 : vector<32x256xf32>
    %c0_130 = arith.constant 0 : index
    %c0_131 = arith.constant 0 : index
    %115 = vector.load %arg7[%c0_130, %c0_131] : memref<1x256xf32, #tpu.memory_space<vmem>>, vector<1x256xf32>
    %116 = vector.broadcast %115 : vector<1x256xf32> to vector<32x256xf32>
    %117 = arith.addf %114, %116 : vector<32x256xf32>
    %cst_132 = arith.constant 0.000000e+00 : f32
    %118 = vector.broadcast %cst_132 : f32 to vector<32x256xf32>
    %119 = arith.maximumf %117, %118 : vector<32x256xf32>
    %120 = vector.shape_cast %119 : vector<32x256xf32> to vector<2x16x256xf32>
    %cst_133 = arith.constant dense<0.000000e+00> : vector<2x256xf32>
    %121 = vector.multi_reduction <add>, %120, %cst_133 [1] : vector<2x16x256xf32> to vector<2x256xf32>
    %cst_134 = arith.constant 6.250000e-02 : f32
    %122 = vector.broadcast %cst_134 : f32 to vector<2x256xf32>
    %123 = arith.mulf %121, %122 : vector<2x256xf32>
    %c0_135 = arith.constant 0 : index
    %c0_136 = arith.constant 0 : index
    %124 = vector.load %arg8[%c0_135, %c0_136] : memref<2x256xf32, #tpu.memory_space<vmem>>, vector<2x256xf32>
    tpu.vector_store %arg8[%c0_135, %c0_136], %123 {strides = array<i32>} : memref<2x256xf32, #tpu.memory_space<vmem>>, vector<2x256xf32>,
    return
  }
  func.func @transform_0(%arg0: i32) -> (i32, i32, i32) {
    %c0_i32 = arith.constant 0 : i32
    %c0_i32_0 = arith.constant 0 : i32
    %c0_i32_1 = arith.constant 0 : i32
    return %arg0, %c0_i32, %c0_i32_0 : i32, i32, i32
  }
  func.func @transform_1(%arg0: i32) -> (i32, i32, i32) {
    %c0_i32 = arith.constant 0 : i32
    %c0_i32_0 = arith.constant 0 : i32
    %c0_i32_1 = arith.constant 0 : i32
    %c0_i32_2 = arith.constant 0 : i32
    return %c0_i32, %c0_i32_0, %c0_i32_1 : i32, i32, i32
  }
  func.func @transform_2(%arg0: i32) -> (i32, i32) {
    %c0_i32 = arith.constant 0 : i32
    %c0_i32_0 = arith.constant 0 : i32
    %c0_i32_1 = arith.constant 0 : i32
    return %c0_i32, %c0_i32_0 : i32, i32
  }
  func.func @transform_3(%arg0: i32) -> (i32, i32, i32) {
    %c0_i32 = arith.constant 0 : i32
    %c0_i32_0 = arith.constant 0 : i32
    %c0_i32_1 = arith.constant 0 : i32
    %c0_i32_2 = arith.constant 0 : i32
    return %c0_i32, %c0_i32_0, %c0_i32_1 : i32, i32, i32
  }
  func.func @transform_4(%arg0: i32) -> (i32, i32) {
    %c0_i32 = arith.constant 0 : i32
    %c0_i32_0 = arith.constant 0 : i32
    %c0_i32_1 = arith.constant 0 : i32
    return %c0_i32, %c0_i32_0 : i32, i32
  }
  func.func @transform_5(%arg0: i32) -> (i32, i32, i32) {
    %c0_i32 = arith.constant 0 : i32
    %c0_i32_0 = arith.constant 0 : i32
    %c0_i32_1 = arith.constant 0 : i32
    %c0_i32_2 = arith.constant 0 : i32
    return %c0_i32, %c0_i32_0, %c0_i32_1 : i32, i32, i32
  }
  func.func @transform_6(%arg0: i32) -> (i32, i32) {
    %c0_i32 = arith.constant 0 : i32
    %c0_i32_0 = arith.constant 0 : i32
    %c0_i32_1 = arith.constant 0 : i32
    return %c0_i32, %c0_i32_0 : i32, i32
  }
  func.func @transform_7(%arg0: i32) -> (i32, i32) {
    %c0_i32 = arith.constant 0 : i32
    %c0_i32_0 = arith.constant 0 : i32
    return %arg0, %c0_i32 : i32, i32
  }
}

</mosaic_0001>

<bundles_post_ra>
// kernel: video_encoder_forward.1
= control target key start
LH: loop header
LB: loop body
LE: loop exit
PB: predicated region body
PF: predicated region fallthrough
CT: control target
= control target key end

     0   :  { %12 = vsyncpa [#allocation6], 0  ;;  %s2995_s0 = inlined_call_operand.vmem [shape: f32[2,16,3], index: 0, kind: input, shape index: {}]   ;;  %s2996_s1 = inlined_call_operand.vmem [shape: f32[3,3,64], index: 1, kind: input, shape index: {}]   ;;  %s2997_s2 = inlined_call_operand.vmem [shape: f32[1,64], index: 2, kind: input, shape index: {}]   ;;  %s2998_s3 = inlined_call_operand.hbm [shape: f32[5,64,128], index: 3, kind: input, shape index: {}]   ;;  %s2999_s4 = inlined_call_operand.vmem [shape: f32[1,128], index: 4, kind: input, shape index: {}]   ;;  %s3000_s5 = inlined_call_operand.hbm [shape: f32[7,128,256], index: 5, kind: input, shape index: {}]   ;;  %s3001_s6 = inlined_call_operand.vmem [shape: f32[1,256], index: 6, kind: input, shape index: {}]   ;;  %s3002_s7 = inlined_call_operand.hbm [shape: f32[2,256], index: 7, kind: output, shape index: {}]  }
   0x1   :  { %13 = vsyncpa [#allocation9], 0 }
   0x2   :  { %14 = vsyncpa [#allocation7], 0  ;;  %s2743_s24 = smov [#allocation5]   ;;  %s2671_s28 = scalar_lea.hbm %s2998_s3, 5120 }
   0x3   :  { %s26_s25 = sshll.u32 %s2743_s24, 4  ;;  %p2672_p0 = scmp.ne.s32.totalorder %s2998_s3, %s2671_s28  ;;  %s27_s25 = int_to_ptr.vmem [resolvable:$true] %s26_s25 }
   0x4   :  { %p2675_p1 = scmp.lt.u32.totalorder %s2671_s28, %s2998_s3 }
   0x6   :  { %p2677_p2 = pnand %p2675_p1, %p2672_p0 }
   0x8   :  { %2680 = shalt.err (!%p2677_p2)
}
   0x9   :  { %s2681_s10 = scalar_lea.vmem %s27_s25, 5120  ;;  %p2686_p4 = scmp.lt.s32.totalorder %s27_s25, %s27_s25 }
   0xa   :  { %p2682_p3 = scmp.ne.s32.totalorder %s27_s25, %s2681_s10  ;;  %p2687_p5 = scmp.lt.s32.totalorder %s2681_s10, %s2681_s10 }
   0xc   :  { %p2688_p6 = por %p2687_p5, %p2686_p4 }
   0xe   :  { %p2689_p7 = pnand %p2688_p6, %p2682_p3 }
  0x10   :  { %2692 = shalt.err (!%p2689_p7)
}
  0x11   :  { %s2744_s11 = smov 128   ;;  %s2745_s12 = smov 8  }
  0x12   :  { %32 = dma.hbm_to_vmem [thread:$0]  %s2998_s3, 5120, %s27_s25, [#allocation6], %s2744_s11, %s2744_s11, %s2745_s12  }
  0x13   :  { %s2746_s15 = smov [#allocation8]   ;;  %s2693_s19 = scalar_lea.hbm %s3000_s5, 28672 }
  0x14   :  { %s40_s16 = sshll.u32 %s2746_s15, 4  ;;  %p2694_p8 = scmp.ne.s32.totalorder %s3000_s5, %s2693_s19  ;;  %s41_s16 = int_to_ptr.vmem [resolvable:$true] %s40_s16 }
  0x15   :  { %p2697_p9 = scmp.lt.u32.totalorder %s2693_s19, %s3000_s5 }
  0x17   :  { %p2699_p10 = pnand %p2697_p9, %p2694_p8 }
  0x19   :  { %2702 = shalt.err (!%p2699_p10)
}
  0x1a   :  { %s2703_s24 = scalar_lea.vmem %s41_s16, 28672  ;;  %p2708_p12 = scmp.lt.s32.totalorder %s41_s16, %s41_s16 }
  0x1b   :  { %p2704_p11 = scmp.ne.s32.totalorder %s41_s16, %s2703_s24  ;;  %p2709_p13 = scmp.lt.s32.totalorder %s2703_s24, %s2703_s24 }
  0x1d   :  { %p2710_p0 = por %p2709_p13, %p2708_p12 }
  0x1f   :  { %p2711_p1 = pnand %p2710_p0, %p2704_p11 }
  0x21   :  { %2714 = shalt.err (!%p2711_p1)
}
  0x22   :  { %s2747_s3 = smov 256   ;;  %s2748_s25 = smov 16  }
  0x23   :  { %46 = dma.hbm_to_vmem [thread:$0]  %s3000_s5, 28672, %s41_s16, [#allocation9], %s2747_s3, %s2747_s3, %s2748_s25  }
  0x24   :  { %2737 = dma.done.wait [#allocation6], 5120  }
  0x25   :  { %2738 = vsyncadd [#allocation6], 4294962176 }
  0x26   :  { %2739 = dma.done.wait [#allocation9], 28672  }
  0x27   :  { %2740 = vsyncadd [#allocation9], 4294938624  ;;  %vm59_vm0 = vcmask 23552   ;;  %vm62_vm1 = vcmask 17408   ;;  %v2749_v0 = vmov 0.0   ;;  %vm94_vm2 = vcmask 1042432  }
  0x28   :  { %60 = vst.msk [vmem:[#allocation2] sm:$0xff] %vm59_vm0, %v2749_v0  ;;  %61 = vst.msk [vmem:[#allocation2 + $0x8] sm:$0xff] %vm59_vm0, %v2749_v0  ;;  %v2038_v1 = vld [vmem:[%s2996_s1 + $0x4] sm:$0x7]  ;;  %v75_v3 = vld [vmem:[%s2996_s1] sm:$0x7] }
  0x29   :  { %64 = vst.msk [vmem:[#allocation2 + $0x18] sm:$0xff] %vm59_vm0, %v2749_v0  ;;  %65 = vst.msk [vmem:[#allocation2 + $0x20] sm:$0xff] %vm59_vm0, %v2749_v0  ;;  %v55_v2 = vld [vmem:[%s2995_s0] sm:$0xff]  ;;  %2152 = vmatprep.subr.msk.mxu1 %vm94_vm2, %v2038_v1  ;;  %v56_v4 = vld [vmem:[%s2995_s0 + $0x8] sm:$0xff]  ;;  %vm408_vm3 = vcmask 523264   ;;  %vm411_vm4 = vcmask 519168  }
  0x2a   :  { %996 = vst [vmem:[#allocation4] sm:$0xff] %v2749_v0  ;;  %997 = vst [vmem:[#allocation4 + $0x8] sm:$0xff] %v2749_v0  ;;  %v57_v5 = vld [vmem:[%s2995_s0 + $0x10] sm:$0xff]  ;;  %v58_v6 = vld [vmem:[%s2995_s0 + $0x18] sm:$0xff]  ;;  %2153 = vmatpush3.msk.msra.mxu1 %vm94_vm2, %v2038_v1  ;;  %vm2012_vm5 = vcmask 1041409   ;;  %vm2014_vm6 = vcmask 1043459  }
  0x2b   :  { %998 = vst [vmem:[#allocation4 + $0x10] sm:$0x3f] %v2749_v0  ;;  %999 = vst [vmem:[#allocation4 + $0x18] sm:$0xff] %v2749_v0  ;;  %v2049_v7 = vld [vmem:[%s2996_s1 + $0x8] sm:$0x7]  ;;  %2160 = vmatprep.subr.msk.mxu1 %vm94_vm2, %v75_v3  ;;  %v437_v20 = vld [vmem:[#allocation5 + $0x40] sm:$0xff] }
  0x2c   :  { %1000 = vst [vmem:[#allocation4 + $0x20] sm:$0xff] %v2749_v0  ;;  %1001 = vst [vmem:[#allocation4 + $0x28] sm:$0x3f] %v2749_v0  ;;  %2168 = vmatprep.subr.msk.mxu0 %vm94_vm2, %v2049_v7  ;;  %v438_v21 = vld [vmem:[#allocation5 + $0x48] sm:$0xff]  ;;  %v439_v23 = vld [vmem:[#allocation5 + $0x50] sm:$0xff]  ;;  %vm2016_vm7 = vcmask 1045509  }
  0x2d   :  { %63 = vst.msk [vmem:[#allocation2 + $0x10] sm:$0x3] %vm62_vm1, %v2749_v0  ;;  %66 = vst.msk [vmem:[#allocation2 + $0x28] sm:$0x3] %vm62_vm1, %v2749_v0  ;;  %2169 = vmatpush3.msk.msra.mxu0 %vm94_vm2, %v2049_v7  ;;  %v2286_v22 = vpack.c.bf16 %v438_v21, %v437_v20  ;;  %v440_v24 = vld [vmem:[#allocation5 + $0x58] sm:$0xff]  ;;  %v441_v26 = vld [vmem:[#allocation5 + $0x60] sm:$0xff] }
  0x2e   :  { %67 = vst.msk [vmem:[#allocation2 + $0x1] sm:$0xff] %vm59_vm0, %v55_v2  ;;  %68 = vst.msk [vmem:[#allocation2 + $0x9] sm:$0xff] %vm59_vm0, %v56_v4  ;;  %v2290_v25 = vpack.c.bf16 %v440_v24, %v439_v23  ;;  %v442_v27 = vld [vmem:[#allocation5 + $0x68] sm:$0xff]  ;;  %v443_v29 = vld [vmem:[#allocation5 + $0x70] sm:$0xff]  ;;  %vm2018_vm8 = vcmask 1047559  }
  0x2f   :  { %69 = vst.msk [vmem:[#allocation2 + $0x19] sm:$0xff] %vm59_vm0, %v57_v5  ;;  %70 = vst.msk [vmem:[#allocation2 + $0x21] sm:$0xff] %vm59_vm0, %v58_v6  ;;  %v2294_v28 = vpack.c.bf16 %v442_v27, %v441_v26  ;;  %v444_v30 = vld [vmem:[#allocation5 + $0x78] sm:$0xff]  ;;  %v424_v32 = vld [vmem:[#allocation5] sm:$0xff] }
  0x30   :  { %410 = vst.msk [vmem:[#allocation3 + $0x8] sm:$0xff] %vm408_vm3, %v2749_v0  ;;  %409 = vst.msk [vmem:[#allocation3] sm:$0xff] %vm408_vm3, %v2749_v0  ;;  %v2298_v31 = vpack.c.bf16 %v444_v30, %v443_v29  ;;  %v425_v33 = vld [vmem:[#allocation5 + $0x8] sm:$0xff]  ;;  %v1265_v36 = vld [vmem:[#allocation8 + $0x218] sm:$0xff] }
  0x31   :  { %412 = vst.msk [vmem:[#allocation3 + $0x10] sm:$0xf] %vm411_vm4, %v2749_v0  ;;  %415 = vst.msk [vmem:[#allocation3 + $0x28] sm:$0xf] %vm411_vm4, %v2749_v0  ;;  %v2886_v34 = vpack.c.bf16 %v425_v33, %v424_v32  ;;  %v1263_v35 = vld [vmem:[#allocation8 + $0x208] sm:$0xff]  ;;  %v1262_v38 = vld [vmem:[#allocation8 + $0x200] sm:$0xff] }
  0x32   :  { %413 = vst.msk [vmem:[#allocation3 + $0x18] sm:$0xff] %vm408_vm3, %v2749_v0  ;;  %414 = vst.msk [vmem:[#allocation3 + $0x20] sm:$0xff] %vm408_vm3, %v2749_v0  ;;  %v2430_v37 = vpack.c.bf16 %v1265_v36, %v1263_v35  ;;  %v1264_v39 = vld [vmem:[#allocation8 + $0x210] sm:$0xff]  ;;  %v1267_v41 = vld [vmem:[#allocation8 + $0x228] sm:$0xff] }
  0x33   :  { %v2432_v40 = vpack.c.bf16 %v1264_v39, %v1262_v38  ;;  %v1269_v42 = vld [vmem:[#allocation8 + $0x238] sm:$0xff]  ;;  %v1266_v44 = vld [vmem:[#allocation8 + $0x220] sm:$0xff]  ;;  %v1268_v45 = vld [vmem:[#allocation8 + $0x230] sm:$0xff] }
  0x34   :  { %2431 = vmatprep.subr.bf16.mxu0 %v2430_v37  ;;  %v2434_v43 = vpack.c.bf16 %v1269_v42, %v1267_v41  ;;  %v2436_v46 = vpack.c.bf16 %v1268_v45, %v1266_v44  ;;  %v1271_v47 = vld [vmem:[#allocation8 + $0x248] sm:$0xff]  ;;  %v1273_v48 = vld [vmem:[#allocation8 + $0x258] sm:$0xff]  ;;  %v1270_v50 = vld [vmem:[#allocation8 + $0x240] sm:$0xff] }
  0x35   :  { %v76_v8 = vld [vmem:[#allocation2 + $0x1] sm:$0xff]  ;;  %v77_v9 = vld [vmem:[#allocation2 + $0x9] sm:$0xff]  ;;  %v2438_v49 = vpack.c.bf16 %v1273_v48, %v1271_v47  ;;  %v1275_v52 = vld [vmem:[#allocation8 + $0x268] sm:$0xff] }
  0x36   :  { %2154 = vmatprep.mubr.msk.f32.mxu1 %vm59_vm0, %v76_v8  ;;  %v78_v10 = vld [vmem:[#allocation2 + $0x19] sm:$0xff]  ;;  %v283_v11 = vld [vmem:[#allocation2 + $0x2] sm:$0xff]  ;;  %v284_v12 = vld [vmem:[#allocation2 + $0xa] sm:$0xff] }
  0x37   :  { %2155 = vmatmul.mubr.msk.f32.vlgmr.msra.gmra.mrb[0].mxu1 %vm59_vm0, %v77_v9  ;;  %v79_v13 = vld [vmem:[#allocation2 + $0x21] sm:$0xff]  ;;  %2170 = vmatprep.mubr.msk.f32.mxu0 %vm59_vm0, %v283_v11  ;;  %v73_v18 = vld [vmem:[#allocation2 + $0x18] sm:$0xff]  ;;  %v1274_v56 = vld [vmem:[#allocation8 + $0x260] sm:$0xff] }
  0x38   :  { %2161 = vmatpush3.msk.msra.mxu1 %vm94_vm2, %v75_v3  ;;  %2157 = vmatprep.mubr.msk.f32.mxu1 %vm59_vm0, %v78_v10  ;;  %v285_v14 = vld [vmem:[#allocation2 + $0x1a] sm:$0xff]  ;;  %v286_v16 = vld [vmem:[#allocation2 + $0x22] sm:$0xff]  ;;  %v1278_v62 = vld [vmem:[#allocation8 + $0x280] sm:$0xff] }
  0x39   :  { %v71_v15 = vld [vmem:[#allocation2] sm:$0xff]  ;;  %2171 = vmatmul.mubr.msk.f32.vlgmr.msra.gmra.mrb[0].mxu0 %vm59_vm0, %v284_v12  ;;  %v72_v17 = vld [vmem:[#allocation2 + $0x8] sm:$0xff]  ;;  %2287 = vmatprep.subr.bf16.mxu1 %v2286_v22  ;;  %v1279_v58 = vld [vmem:[#allocation8 + $0x288] sm:$0xff] }
  0x3a   :  { %2173 = vmatprep.mubr.msk.f32.mxu0 %vm59_vm0, %v285_v14  ;;  %v74_v19 = vld [vmem:[#allocation2 + $0x20] sm:$0xff]  ;;  %2433 = vmatpush1.bf16.msra.mxu0 %v2432_v40  ;;  %v1277_v54 = vld [vmem:[#allocation8 + $0x278] sm:$0xff]  ;;  %v429_v29 = vld [vmem:[#allocation5 + $0x28] sm:$0xff] }
  0x3b   :  { %2158 = vmatmul.mubr.msk.f32.gmra.mrb[2].mxu1 %vm59_vm0, %v79_v13  ;;  %2435 = vmatprep.subr.bf16.mxu0 %v2434_v43  ;;  %v1272_v51 = vld [vmem:[#allocation8 + $0x250] sm:$0xff]  ;;  %v2442_v55 = vpack.c.bf16 %v1277_v54, %v1275_v52  ;;  %v1281_v59 = vld [vmem:[#allocation8 + $0x298] sm:$0xff]  ;;  %v644_v38 = vld [vmem:[#allocation5 + $0x80] sm:$0xff] }
  0x3c   :  { %2162 = vmatprep.mubr.msk.f32.mxu1 %vm59_vm0, %v71_v15  ;;  %v2440_v53 = vpack.c.bf16 %v1272_v51, %v1270_v50  ;;  %v1276_v57 = vld [vmem:[#allocation8 + $0x270] sm:$0xff]  ;;  %v2446_v61 = vpack.c.bf16 %v1281_v59, %v1279_v58  ;;  %v427_v24 = vld [vmem:[#allocation5 + $0x18] sm:$0xff]  ;;  %v645_v39 = vld [vmem:[#allocation5 + $0x88] sm:$0xff] }
  0x3d   :  { %2174 = vmatmul.mubr.msk.f32.gmra.mrb[2].mxu0 %vm59_vm0, %v286_v16  ;;  %v2444_v60 = vpack.c.bf16 %v1276_v57, %v1274_v56  ;;  %v1280_v63 = vld [vmem:[#allocation8 + $0x290] sm:$0xff]  ;;  %v431_v35 = vld [vmem:[#allocation5 + $0x38] sm:$0xff]  ;;  %v648_v44 = vld [vmem:[#allocation5 + $0xa0] sm:$0xff] }
  0x3e   :  { %1358 = vmatprep.mubr.f32.mxu0 %v2749_v0  ;;  %2437 = vmatpush1.bf16.msra.mxu0 %v2436_v46  ;;  %v2448_v1 = vpack.c.bf16 %v1280_v63, %v1278_v62  ;;  %v2055_v6 = vld [vmem:[%s2997_s2] ss:$0 sm:$0xff]  ;;  %v647_v41 = vld [vmem:[#allocation5 + $0x98] sm:$0xff]  ;;  %v649_v45 = vld [vmem:[#allocation5 + $0xa8] sm:$0xff] }
  0x3f   :  { %2163 = vmatmul.mubr.msk.f32.vlgmr.msra.gmra.mrb[0].mxu1 %vm59_vm0, %v72_v17  ;;  %2439 = vmatprep.subr.bf16.mxu0 %v2438_v49  ;;  %v426_v23 = vld [vmem:[#allocation5 + $0x10] sm:$0xff]  ;;  %v2326_v47 = vpack.c.bf16 %v649_v45, %v648_v44  ;;  %v651_v50 = vld [vmem:[#allocation5 + $0xb8] sm:$0xff]  ;;  %v759_v54 = vld [vmem:[#allocation5 + $0xc8] sm:$0xff] }
  0x40   :  { %2165 = vmatprep.mubr.msk.f32.mxu1 %vm59_vm0, %v73_v18  ;;  %2289 = vmatpush3.bf16.msra.mxu1 %v2286_v22  ;;  %v2306_v27 = vpack.c.bf16 %v427_v24, %v426_v23  ;;  %v430_v33 = vld [vmem:[#allocation5 + $0x30] sm:$0xff]  ;;  %v761_v57 = vld [vmem:[#allocation5 + $0xd8] sm:$0xff] }
  0x41   :  { %2291 = vmatprep.subr.bf16.mxu1 %v2290_v25  ;;  %v2314_v37 = vpack.c.bf16 %v431_v35, %v430_v33  ;;  %v646_v40 = vld [vmem:[#allocation5 + $0x90] sm:$0xff]  ;;  %v1050_v23 = vld [vmem:[#allocation8 + $0x118] sm:$0xff]  ;;  %v1056_v35 = vld [vmem:[#allocation8 + $0x148] sm:$0xff] }
  0x42   :  { %2441 = vmatpush1.bf16.msra.mxu0 %v2440_v53  ;;  %v2322_v42 = vpack.c.bf16 %v647_v41, %v646_v40  ;;  %v650_v49 = vld [vmem:[#allocation5 + $0xb0] sm:$0xff]  ;;  %v758_v53 = vld [vmem:[#allocation5 + $0xc0] sm:$0xff] }
  0x43   :  { %2166 = vmatmul.mubr.msk.f32.gmra.mrb[2].mxu1 %vm59_vm0, %v74_v19  ;;  %2443 = vmatprep.subr.bf16.mxu0 %v2442_v55  ;;  %v2330_v52 = vpack.c.bf16 %v651_v50, %v650_v49  ;;  %v2334_v55 = vpack.c.bf16 %v759_v54, %v758_v53  ;;  %v760_v56 = vld [vmem:[#allocation5 + $0xd0] sm:$0xff]  ;;  %v1066_v49 = vld [vmem:[#allocation8 + $0x198] sm:$0xff] }
  0x44   :  { %2293 = vmatpush3.bf16.msra.mxu1 %v2290_v25  ;;  %v2338_v58 = vpack.c.bf16 %v761_v57, %v760_v56  ;;  %v1057_v40 = vld [vmem:[#allocation8 + $0x150] sm:$0xff]  ;;  %v1070_v56 = vld [vmem:[#allocation8 + $0x1b8] sm:$0xff]  ;;  %v1283_v57 = vld [vmem:[#allocation8 + $0x2a8] sm:$0xff] }
  0x45   :  { %2295 = vmatprep.subr.bf16.mxu1 %v2294_v28  ;;  %v1065_v53 = vld [vmem:[#allocation8 + $0x190] sm:$0xff] }
  0x46   :  { %2445 = vmatpush1.bf16.msra.mxu0 %v2444_v60  ;;  %v762_v60 = vld [vmem:[#allocation5 + $0xe0] sm:$0xff] }
  0x47   :  { %2447 = vmatprep.subr.bf16.mxu0 %v2446_v61  ;;  %v763_v61 = vld [vmem:[#allocation5 + $0xe8] sm:$0xff] }
  0x48   :  { %2297 = vmatpush3.bf16.msra.mxu1 %v2294_v28  ;;  %v428_v28 = vld [vmem:[#allocation5 + $0x20] sm:$0xff]  ;;  %v2342_v63 = vpack.c.bf16 %v763_v61, %v762_v60 }
  0x49   :  { %2299 = vmatprep.subr.bf16.mxu1 %v2298_v31  ;;  %v2310_v32 = vpack.c.bf16 %v429_v29, %v428_v28  ;;  %v1054_v28 = vld [vmem:[#allocation8 + $0x138] sm:$0xff]  ;;  %v1067_v60 = vld [vmem:[#allocation8 + $0x1a0] sm:$0xff] }
  0x4a   :  { %2449 = vmatpush1.bf16.msra.mxu0 %v2448_v1 }
  0x4c   :  { %2301 = vmatpush3.bf16.msra.mxu1 %v2298_v31 }
  0x4d   :  { %2303 = vmatprep.subr.bf16.mxu1 %v2886_v34 }
 0x10c   :  { %v2172_v2 = vpop.f32.mrb[0].mxu0 }
 0x10d   :  { %v370_v3 = vpop.f32.mrb[1].mxu0 }
 0x110   :  { %v2175_v4 = vpop.f32.mrb[2].mxu0 }
 0x111   :  { %v380_v7 = vpop.f32.mrb[3].mxu0 }
 0x112   :  { %v2164_v5 = vpop.f32.mrb[0].mxu1 }
 0x113   :  { %v2590_v8 = vadd.f32 %v2172_v2, %v2164_v5  ;;  %v264_v9 = vpop.f32.mrb[1].mxu1  ;;  %v764_v2 = vld [vmem:[#allocation5 + $0xf0] sm:$0xff] }
 0x114   :  { %v2591_v10 = vadd.f32 %v370_v3, %v264_v9  ;;  %v765_v3 = vld [vmem:[#allocation5 + $0xf8] sm:$0xff]  ;;  %v874_v9 = vld [vmem:[#allocation5 + $0x110] sm:$0xff] }
 0x115   :  { %v401_v11 = vadd.f32 %v2590_v8, %v2055_v6  ;;  %v2346_v5 = vpack.c.bf16 %v765_v3, %v764_v2 }
 0x116   :  { %v400_v12 = vadd.f32 %v2591_v10, %v2055_v6  ;;  %v2167_v13 = vpop.f32.mrb[2].mxu1  ;;  %v875_v10 = vld [vmem:[#allocation5 + $0x118] sm:$0xff] }
 0x117   :  { %v405_v14 = vmax.f32 %v401_v11, 0.0  ;;  %v2592_v15 = vadd.f32 %v2175_v4, %v2167_v13  ;;  %v274_v16 = vpop.f32.mrb[3].mxu1  ;;  %v2354_v11 = vpack.c.bf16 %v875_v10, %v874_v9  ;;  %v876_v13 = vld [vmem:[#allocation5 + $0x120] sm:$0xff]  ;;  %v1073_v10 = vld [vmem:[#allocation8 + $0x1d0] sm:$0xff] }
 0x118   :  { %v404_v17 = vmax.f32 %v400_v12, 0.0  ;;  %v2593_v18 = vadd.f32 %v380_v7, %v274_v16  ;;  %v873_v7 = vld [vmem:[#allocation5 + $0x108] sm:$0xff]  ;;  %v1071_v9 = vld [vmem:[#allocation8 + $0x1c0] sm:$0xff] }
 0x119   :  { %417 = vst.msk [vmem:[#allocation3 + $0xa] sm:$0xff] %vm408_vm3, %v405_v14  ;;  %v403_v19 = vadd.f32 %v2592_v15, %v2055_v6  ;;  %v877_v14 = vld [vmem:[#allocation5 + $0x128] sm:$0xff] }
 0x11a   :  { %416 = vst.msk [vmem:[#allocation3 + $0x2] sm:$0xff] %vm408_vm3, %v404_v17  ;;  %v402_v20 = vadd.f32 %v2593_v18, %v2055_v6  ;;  %v872_v6 = vld [vmem:[#allocation5 + $0x100] sm:$0xff]  ;;  %v2358_v16 = vpack.c.bf16 %v877_v14, %v876_v13  ;;  %v878_v18 = vld [vmem:[#allocation5 + $0x130] sm:$0xff] }
 0x11b   :  { %v407_v21 = vmax.f32 %v403_v19, 0.0  ;;  %v2350_v8 = vpack.c.bf16 %v873_v7, %v872_v6  ;;  %v879_v19 = vld [vmem:[#allocation5 + $0x138] sm:$0xff]  ;;  %v1287_v6 = vld [vmem:[#allocation8 + $0x2c8] sm:$0xff]  ;;  %v1286_v13 = vld [vmem:[#allocation8 + $0x2c0] sm:$0xff] }
 0x11c   :  { %v406_v22 = vmax.f32 %v402_v20, 0.0  ;;  %v1288_v14 = vld [vmem:[#allocation8 + $0x2d0] sm:$0xff] }
 0x11d   :  { %419 = vst.msk [vmem:[#allocation3 + $0x22] sm:$0xff] %vm408_vm3, %v407_v21  ;;  %v2362_v21 = vpack.c.bf16 %v879_v19, %v878_v18  ;;  %v1291_v18 = vld [vmem:[#allocation8 + $0x2e8] sm:$0xff] }
 0x11e   :  { %418 = vst.msk [vmem:[#allocation3 + $0x1a] sm:$0xff] %vm408_vm3, %v406_v22  ;;  %v1048_v22 = vld [vmem:[#allocation8 + $0x108] sm:$0xff] }
 0x11f   :  { %v2366_v24 = vpack.c.bf16 %v1050_v23, %v1048_v22  ;;  %v1077_v22 = vld [vmem:[#allocation8 + $0x1f0] sm:$0xff] }
 0x120   :  { %v640_v59 = vld [vmem:[#allocation3 + $0xa] sm:$0xff] }
 0x121   :  { %v432_v25 = vld [vmem:[#allocation3 + $0x1] sm:$0xff]  ;;  %v433_v26 = vld [vmem:[#allocation3 + $0x9] sm:$0xff] }
 0x122   :  { %2192 = vmatprep.mubr.msk.f32.mxu1 %vm408_vm3, %v432_v25  ;;  %v420_v36 = vld [vmem:[#allocation3] sm:$0xff]  ;;  %v421_v43 = vld [vmem:[#allocation3 + $0x8] sm:$0xff] }
 0x123   :  { %2193 = vmatmul.mubr.msk.f32.vlgmr.msra.gmra.mrb[4].mxu1 %vm408_vm3, %v433_v26  ;;  %v639_v51 = vld [vmem:[#allocation3 + $0x2] sm:$0xff]  ;;  %v754_v12 = vld [vmem:[#allocation3 + $0xb] sm:$0xff] }
 0x124   :  { %2305 = vmatpush3.bf16.msra.mxu1 %v2886_v34  ;;  %v2318_v34 = vpack.c.bf16 %v645_v39, %v644_v38  ;;  %v642_v1 = vld [vmem:[#allocation3 + $0x22] sm:$0xff]  ;;  %v1049_v26 = vld [vmem:[#allocation8 + $0x110] sm:$0xff] }
 0x125   :  { %v434_v30 = vld [vmem:[#allocation3 + $0x19] sm:$0xff]  ;;  %2307 = vmatprep.subr.bf16.mxu1 %v2306_v27  ;;  %v435_v31 = vld [vmem:[#allocation3 + $0x21] sm:$0xff]  ;;  %v868_v33 = vld [vmem:[#allocation3 + $0xc] sm:$0xff] }
 0x126   :  { %2195 = vmatprep.mubr.msk.f32.mxu1 %vm408_vm3, %v434_v30  ;;  %v422_v46 = vld [vmem:[#allocation3 + $0x18] sm:$0xff]  ;;  %v423_v48 = vld [vmem:[#allocation3 + $0x20] sm:$0xff] }
 0x127   :  { %2196 = vmatmul.mubr.msk.f32.gmra.mrb[6].mxu1 %vm408_vm3, %v435_v31  ;;  %v641_v62 = vld [vmem:[#allocation3 + $0x1a] sm:$0xff]  ;;  %v753_v4 = vld [vmem:[#allocation3 + $0x3] sm:$0xff] }
 0x128   :  { %2309 = vmatpush3.bf16.msra.mxu1 %v2306_v27  ;;  %2214 = vmatprep.mubr.msk.f32.mxu1 %vm408_vm3, %v420_v36  ;;  %v755_v15 = vld [vmem:[#allocation3 + $0x1b] sm:$0xff]  ;;  %v756_v17 = vld [vmem:[#allocation3 + $0x23] sm:$0xff] }
 0x129   :  { %2311 = vmatprep.subr.bf16.mxu1 %v2310_v32  ;;  %v867_v20 = vld [vmem:[#allocation3 + $0x4] sm:$0xff]  ;;  %v1058_v36 = vld [vmem:[#allocation8 + $0x158] sm:$0xff] }
 0x12a   :  { %v1047_v25 = vld [vmem:[#allocation8 + $0x100] sm:$0xff]  ;;  %v1052_v27 = vld [vmem:[#allocation8 + $0x128] sm:$0xff]  ;;  %v2374_v39 = vpack.c.bf16 %v1058_v36, %v1056_v35  ;;  %v2076_v35 = vld [vmem:[%s2999_s4] ss:$0 sm:$0xff] }
 0x12b   :  { %v2368_v29 = vpack.c.bf16 %v1049_v26, %v1047_v25  ;;  %v2370_v30 = vpack.c.bf16 %v1054_v28, %v1052_v27  ;;  %v1051_v31 = vld [vmem:[#allocation8 + $0x120] sm:$0xff]  ;;  %v1292_v26 = vld [vmem:[#allocation8 + $0x2f0] sm:$0xff]  ;;  %v1011_v28 = vld [vmem:[#allocation8 + $0x8] sm:$0xff] }
 0x12c   :  { %2313 = vmatpush3.bf16.msra.mxu1 %v2310_v32  ;;  %v1053_v32 = vld [vmem:[#allocation8 + $0x130] sm:$0xff]  ;;  %v870_v41 = vld [vmem:[#allocation3 + $0x24] sm:$0xff] }
 0x12d   :  { %2315 = vmatprep.subr.bf16.mxu1 %v2314_v37  ;;  %v2372_v38 = vpack.c.bf16 %v1053_v32, %v1051_v31  ;;  %v1290_v25 = vld [vmem:[#allocation8 + $0x2e0] sm:$0xff]  ;;  %v1399_v32 = vld [vmem:[#allocation8 + $0x318] sm:$0xff] }
 0x12e   :  { %v2460_v27 = vpack.c.bf16 %v1292_v26, %v1290_v25  ;;  %v1410_v25 = vld [vmem:[#allocation8 + $0x370] sm:$0xff] }
 0x130   :  { %2317 = vmatpush3.bf16.msra.mxu1 %v2314_v37  ;;  %v869_v37 = vld [vmem:[#allocation3 + $0x1c] sm:$0xff] }
 0x131   :  { %2319 = vmatprep.subr.bf16.mxu1 %v2318_v34 }
 0x133   :  { %2215 = vmatmul.mubr.msk.f32.vlgmr.msra.gmra.mrb[4].mxu1 %vm408_vm3, %v421_v43  ;;  %v1062_v43 = vld [vmem:[#allocation8 + $0x178] sm:$0xff] }
 0x134   :  { %2217 = vmatprep.mubr.msk.f32.mxu1 %vm408_vm3, %v422_v46  ;;  %2321 = vmatpush3.bf16.msra.mxu1 %v2318_v34  ;;  %v1055_v34 = vld [vmem:[#allocation8 + $0x140] sm:$0xff] }
 0x135   :  { %2323 = vmatprep.subr.bf16.mxu1 %v2322_v42  ;;  %v2376_v44 = vpack.c.bf16 %v1057_v40, %v1055_v34  ;;  %v1059_v46 = vld [vmem:[#allocation8 + $0x160] sm:$0xff] }
 0x137   :  { %2218 = vmatmul.mubr.msk.f32.gmra.mrb[6].mxu1 %vm408_vm3, %v423_v48  ;;  %v1064_v48 = vld [vmem:[#allocation8 + $0x188] sm:$0xff] }
 0x138   :  { %2325 = vmatpush3.bf16.msra.mxu1 %v2322_v42  ;;  %2236 = vmatprep.mubr.msk.f32.mxu1 %vm408_vm3, %v639_v51  ;;  %v1060_v42 = vld [vmem:[#allocation8 + $0x168] sm:$0xff]  ;;  %v2382_v51 = vpack.c.bf16 %v1066_v49, %v1064_v48  ;;  %v1012_v48 = vld [vmem:[#allocation8 + $0x10] sm:$0xff]  ;;  %v1396_v49 = vld [vmem:[#allocation8 + $0x300] sm:$0xff] }
 0x139   :  { %2327 = vmatprep.subr.bf16.mxu1 %v2326_v47  ;;  %v2378_v45 = vpack.c.bf16 %v1062_v43, %v1060_v42 }
 0x13c   :  { %2329 = vmatpush3.bf16.msra.mxu1 %v2326_v47  ;;  %v1061_v47 = vld [vmem:[#allocation8 + $0x170] sm:$0xff] }
 0x13d   :  { %2331 = vmatprep.subr.bf16.mxu1 %v2330_v52  ;;  %v2380_v50 = vpack.c.bf16 %v1061_v47, %v1059_v46  ;;  %v1010_v46 = vld [vmem:[#allocation8] sm:$0xff] }
 0x140   :  { %2333 = vmatpush3.bf16.msra.mxu1 %v2330_v52  ;;  %v1063_v52 = vld [vmem:[#allocation8 + $0x180] sm:$0xff] }
 0x141   :  { %2335 = vmatprep.subr.bf16.mxu1 %v2334_v55  ;;  %v2384_v54 = vpack.c.bf16 %v1065_v53, %v1063_v52  ;;  %v1017_v52 = vld [vmem:[#allocation8 + $0x38] sm:$0xff]  ;;  %v1401_v53 = vld [vmem:[#allocation8 + $0x328] sm:$0xff] }
 0x143   :  { %2237 = vmatmul.mubr.msk.f32.vlgmr.msra.gmra.mrb[4].mxu1 %vm408_vm3, %v640_v59  ;;  %v1285_v59 = vld [vmem:[#allocation8 + $0x2b8] sm:$0xff] }
 0x144   :  { %2239 = vmatprep.mubr.msk.f32.mxu1 %vm408_vm3, %v641_v62  ;;  %2337 = vmatpush3.bf16.msra.mxu1 %v2334_v55  ;;  %v1068_v55 = vld [vmem:[#allocation8 + $0x1a8] sm:$0xff]  ;;  %v2450_v61 = vpack.c.bf16 %v1285_v59, %v1283_v57  ;;  %v1069_v62 = vld [vmem:[#allocation8 + $0x1b0] sm:$0xff]  ;;  %v1014_v57 = vld [vmem:[#allocation8 + $0x20] sm:$0xff] }
 0x145   :  { %2339 = vmatprep.subr.bf16.mxu1 %v2338_v58  ;;  %v2388_v2 = vpack.c.bf16 %v1069_v62, %v1067_v60  ;;  %v1400_v60 = vld [vmem:[#allocation8 + $0x320] sm:$0xff]  ;;  %v1019_v62 = vld [vmem:[#allocation8 + $0x48] sm:$0xff] }
 0x146   :  { %2451 = vmatprep.subr.bf16.mxu0 %v2450_v61  ;;  %v1402_v61 = vld [vmem:[#allocation8 + $0x330] sm:$0xff] }
 0x147   :  { %2240 = vmatmul.mubr.msk.f32.gmra.mrb[6].mxu1 %vm408_vm3, %v642_v1  ;;  %v1284_v1 = vld [vmem:[#allocation8 + $0x2b0] sm:$0xff] }
 0x148   :  { %2341 = vmatpush3.bf16.msra.mxu1 %v2338_v58  ;;  %2258 = vmatprep.mubr.msk.f32.mxu1 %vm408_vm3, %v753_v4  ;;  %v2386_v58 = vpack.c.bf16 %v1070_v56, %v1068_v55  ;;  %v1072_v4 = vld [vmem:[#allocation8 + $0x1c8] sm:$0xff]  ;;  %v2400_v55 = vpack.c.bf16 %v1012_v48, %v1010_v46  ;;  %v1414_v46 = vld [vmem:[#allocation8 + $0x390] sm:$0xff] }
 0x149   :  { %2343 = vmatprep.subr.bf16.mxu1 %v2342_v63 }
 0x14c   :  { %2345 = vmatpush3.bf16.msra.mxu1 %v2342_v63  ;;  %v1282_v63 = vld [vmem:[#allocation8 + $0x2a0] sm:$0xff] }
 0x14d   :  { %2347 = vmatprep.subr.bf16.mxu1 %v2346_v5  ;;  %v2452_v3 = vpack.c.bf16 %v1284_v1, %v1282_v63 }
 0x14f   :  { %2453 = vmatpush1.bf16.msra.mxu0 %v2452_v3  ;;  %v1021_v3 = vld [vmem:[#allocation8 + $0x58] sm:$0xff] }
 0x150   :  { %2349 = vmatpush3.bf16.msra.mxu1 %v2346_v5  ;;  %v1074_v5 = vld [vmem:[#allocation8 + $0x1d8] sm:$0xff] }
 0x151   :  { %2351 = vmatprep.subr.bf16.mxu1 %v2350_v8  ;;  %v2390_v7 = vpack.c.bf16 %v1074_v5, %v1072_v4  ;;  %v1405_v4 = vld [vmem:[#allocation8 + $0x348] sm:$0xff]  ;;  %v1407_v5 = vld [vmem:[#allocation8 + $0x358] sm:$0xff] }
 0x153   :  { %2259 = vmatmul.mubr.msk.f32.vlgmr.msra.gmra.mrb[4].mxu1 %vm408_vm3, %v754_v12  ;;  %v2392_v12 = vpack.c.bf16 %v1073_v10, %v1071_v9  ;;  %v1020_v9 = vld [vmem:[#allocation8 + $0x50] sm:$0xff]  ;;  %v2406_v10 = vpack.c.bf16 %v1021_v3, %v1019_v62  ;;  %v1416_v62 = vld [vmem:[#allocation8 + $0x3a0] sm:$0xff]  ;;  %v1421_v3 = vld [vmem:[#allocation8 + $0x3c8] sm:$0xff] }
 0x154   :  { %2261 = vmatprep.mubr.msk.f32.mxu1 %vm408_vm3, %v755_v15  ;;  %2353 = vmatpush3.bf16.msra.mxu1 %v2350_v8  ;;  %v1289_v8 = vld [vmem:[#allocation8 + $0x2d8] sm:$0xff]  ;;  %v2456_v15 = vpack.c.bf16 %v1288_v14, %v1286_v13  ;;  %v1023_v13 = vld [vmem:[#allocation8 + $0x68] sm:$0xff] }
 0x155   :  { %2355 = vmatprep.subr.bf16.mxu1 %v2354_v11 }
 0x157   :  { %2262 = vmatmul.mubr.msk.f32.gmra.mrb[6].mxu1 %vm408_vm3, %v756_v17  ;;  %v1078_v17 = vld [vmem:[#allocation8 + $0x1f8] sm:$0xff] }
 0x158   :  { %2357 = vmatpush3.bf16.msra.mxu1 %v2354_v11  ;;  %2280 = vmatprep.mubr.msk.f32.mxu1 %vm408_vm3, %v867_v20  ;;  %v2454_v11 = vpack.c.bf16 %v1289_v8, %v1287_v6  ;;  %v1293_v20 = vld [vmem:[#allocation8 + $0x2f8] sm:$0xff]  ;;  %v1018_v8 = vld [vmem:[#allocation8 + $0x40] sm:$0xff] }
 0x159   :  { %2359 = vmatprep.subr.bf16.mxu1 %v2358_v16  ;;  %v2458_v23 = vpack.c.bf16 %v1293_v20, %v1291_v18  ;;  %v1409_v18 = vld [vmem:[#allocation8 + $0x368] sm:$0xff]  ;;  %v1022_v20 = vld [vmem:[#allocation8 + $0x60] sm:$0xff] }
 0x15a   :  { %2455 = vmatprep.subr.bf16.mxu0 %v2454_v11  ;;  %v1404_v11 = vld [vmem:[#allocation8 + $0x340] sm:$0xff] }
 0x15b   :  { %2457 = vmatpush1.bf16.msra.mxu0 %v2456_v15 }
 0x15c   :  { %2361 = vmatpush3.bf16.msra.mxu1 %v2358_v16  ;;  %v1076_v16 = vld [vmem:[#allocation8 + $0x1e8] sm:$0xff]  ;;  %2459 = vmatprep.subr.bf16.mxu0 %v2458_v23  ;;  %v1024_v23 = vld [vmem:[#allocation8 + $0x70] sm:$0xff] }
 0x15d   :  { %2363 = vmatprep.subr.bf16.mxu1 %v2362_v21  ;;  %v2394_v19 = vpack.c.bf16 %v1078_v17, %v1076_v16  ;;  %v2470_v16 = vpack.c.bf16 %v1407_v5, %v1405_v4  ;;  %v1025_v17 = vld [vmem:[#allocation8 + $0x78] sm:$0xff] }
 0x15e   :  { %v2410_v26 = vpack.c.bf16 %v1025_v17, %v1023_v13  ;;  %v1423_v4 = vld [vmem:[#allocation8 + $0x3d8] sm:$0xff]  ;;  %v1039_v13 = vld [vmem:[#allocation8 + $0xe8] sm:$0xff] }
 0x15f   :  { %2461 = vmatpush1.bf16.msra.mxu0 %v2460_v27  ;;  %v1027_v27 = vld [vmem:[#allocation8 + $0x88] sm:$0xff] }
 0x160   :  { %2365 = vmatpush3.bf16.msra.mxu1 %v2362_v21  ;;  %v1075_v21 = vld [vmem:[#allocation8 + $0x1e0] sm:$0xff] }
 0x161   :  { %2367 = vmatprep.subr.bf16.mxu1 %v2366_v24  ;;  %v2396_v24 = vpack.c.bf16 %v1077_v22, %v1075_v21  ;;  %v2408_v21 = vpack.c.bf16 %v1020_v9, %v1018_v8  ;;  %v1036_v8 = vld [vmem:[#allocation8 + $0xd0] sm:$0xff] }
 0x163   :  { %2281 = vmatmul.mubr.msk.f32.vlgmr.msra.gmra.mrb[4].mxu1 %vm408_vm3, %v868_v33 }
 0x164   :  { %2283 = vmatprep.mubr.msk.f32.mxu1 %vm408_vm3, %v869_v37  ;;  %2369 = vmatpush1.bf16.msra.mxu1 %v2368_v29  ;;  %v1013_v29 = vld [vmem:[#allocation8 + $0x18] sm:$0xff] }
 0x165   :  { %2371 = vmatprep.subr.bf16.mxu1 %v2370_v30  ;;  %v1397_v30 = vld [vmem:[#allocation8 + $0x308] sm:$0xff]  ;;  %v2398_v31 = vpack.c.bf16 %v1013_v29, %v1011_v28  ;;  %v1029_v28 = vld [vmem:[#allocation8 + $0x98] sm:$0xff] }
 0x166   :  { %v2462_v33 = vpack.c.bf16 %v1399_v32, %v1397_v30  ;;  %v1413_v29 = vld [vmem:[#allocation8 + $0x388] sm:$0xff]  ;;  %v2414_v48 = vpack.c.bf16 %v1029_v28, %v1027_v27 }
 0x167   :  { %2284 = vmatmul.mubr.msk.f32.gmra.mrb[6].mxu1 %vm408_vm3, %v870_v41 }
 0x168   :  { %2373 = vmatpush1.bf16.msra.mxu1 %v2372_v38  ;;  %1143 = vmatprep.mubr.f32.mxu1 %v2749_v0 }
 0x169   :  { %2375 = vmatprep.subr.bf16.mxu1 %v2374_v39  ;;  %2463 = vmatprep.subr.bf16.mxu0 %v2462_v33  ;;  %v1415_v33 = vld [vmem:[#allocation8 + $0x398] sm:$0xff] }
 0x16c   :  { %2377 = vmatpush1.bf16.msra.mxu1 %v2376_v44 }
 0x16d   :  { %2379 = vmatprep.subr.bf16.mxu1 %v2378_v45 }
 0x170   :  { %2381 = vmatpush1.bf16.msra.mxu1 %v2380_v50  ;;  %v1398_v50 = vld [vmem:[#allocation8 + $0x310] sm:$0xff] }
 0x171   :  { %2383 = vmatprep.subr.bf16.mxu1 %v2382_v51  ;;  %v1015_v51 = vld [vmem:[#allocation8 + $0x28] sm:$0xff]  ;;  %v2464_v56 = vpack.c.bf16 %v1398_v50, %v1396_v49  ;;  %v2478_v49 = vpack.c.bf16 %v1415_v33, %v1413_v29  ;;  %v1537_v33 = vld [vmem:[#allocation8 + $0x438] sm:$0xff] }
 0x172   :  { %v2402_v59 = vpack.c.bf16 %v1017_v52, %v1015_v51  ;;  %v1031_v50 = vld [vmem:[#allocation8 + $0xa8] sm:$0xff]  ;;  %v1033_v51 = vld [vmem:[#allocation8 + $0xb8] sm:$0xff] }
 0x173   :  { %v1417_v52 = vld [vmem:[#allocation8 + $0x3a8] sm:$0xff] }
 0x174   :  { %2385 = vmatpush1.bf16.msra.mxu1 %v2384_v54  ;;  %v1403_v54 = vld [vmem:[#allocation8 + $0x338] sm:$0xff] }
 0x175   :  { %2387 = vmatprep.subr.bf16.mxu1 %v2386_v58  ;;  %v1016_v58 = vld [vmem:[#allocation8 + $0x30] sm:$0xff] }
 0x176   :  { %v2404_v6 = vpack.c.bf16 %v1016_v58, %v1014_v57  ;;  %v1030_v58 = vld [vmem:[#allocation8 + $0xa0] sm:$0xff] }
 0x178   :  { %2389 = vmatpush1.bf16.msra.mxu1 %v2388_v2  ;;  %v2466_v2 = vpack.c.bf16 %v1403_v54, %v1401_v53 }
 0x179   :  { %2391 = vmatprep.subr.bf16.mxu1 %v2390_v7  ;;  %v2468_v7 = vpack.c.bf16 %v1402_v61, %v1400_v60  ;;  %v2418_v60 = vpack.c.bf16 %v1033_v51, %v1031_v50  ;;  %v1538_v51 = vld [vmem:[#allocation8 + $0x440] sm:$0xff] }
 0x17c   :  { %2393 = vmatpush1.bf16.msra.mxu1 %v2392_v12  ;;  %v1406_v12 = vld [vmem:[#allocation8 + $0x350] sm:$0xff] }
 0x17d   :  { %2395 = vmatprep.subr.bf16.mxu1 %v2394_v19  ;;  %v1411_v19 = vld [vmem:[#allocation8 + $0x378] sm:$0xff]  ;;  %v2472_v22 = vpack.c.bf16 %v1406_v12, %v1404_v11  ;;  %v1420_v11 = vld [vmem:[#allocation8 + $0x3c0] sm:$0xff]  ;;  %v1422_v12 = vld [vmem:[#allocation8 + $0x3d0] sm:$0xff] }
 0x17e   :  { %v2474_v32 = vpack.c.bf16 %v1411_v19, %v1409_v18  ;;  %v2488_v18 = vpack.c.bf16 %v1422_v12, %v1420_v11  ;;  %v1038_v19 = vld [vmem:[#allocation8 + $0xe0] sm:$0xff]  ;;  %v1559_v11 = vld [vmem:[#allocation8 + $0x4e8] sm:$0xff]  ;;  %v1561_v12 = vld [vmem:[#allocation8 + $0x4f8] sm:$0xff] }
 0x180   :  { %2397 = vmatpush1.bf16.msra.mxu1 %v2396_v24  ;;  %v1408_v24 = vld [vmem:[#allocation8 + $0x360] sm:$0xff] }
 0x181   :  { %2399 = vmatprep.subr.bf16.mxu1 %v2398_v31 }
 0x236   :  { %v2282_v36 = vpop.f32.mrb[4].mxu1 }
 0x237   :  { %v2921_v37 = vadd.f32 %v2282_v36, %v2076_v35  ;;  %v958_v38 = vpop.f32.mrb[5].mxu1  ;;  %v2412_v36 = vpack.c.bf16 %v1024_v23, %v1022_v20  ;;  %v1424_v23 = vld [vmem:[#allocation8 + $0x3e0] sm:$0xff] }
 0x238   :  { %v2923_v39 = vadd.f32 %v2076_v35, %v958_v38  ;;  %v2476_v38 = vpack.c.bf16 %v1410_v25, %v1408_v24  ;;  %v1426_v24 = vld [vmem:[#allocation8 + $0x3f0] sm:$0xff]  ;;  %v1531_v25 = vld [vmem:[#allocation8 + $0x408] sm:$0xff] }
 0x239   :  { %v993_v34 = vmax.f32 %v2921_v37, 0.0  ;;  %v2492_v28 = vpack.c.bf16 %v1426_v24, %v1424_v23 }
 0x23a   :  { %v992_v40 = vmax.f32 %v2923_v39, 0.0  ;;  %v2285_v41 = vpop.f32.mrb[6].mxu1 }
 0x23b   :  { %1003 = vst [vmem:[#allocation4 + $0xb] sm:$0xff] %v993_v34  ;;  %v2929_v42 = vadd.f32 %v2285_v41, %v2076_v35  ;;  %v968_v43 = vpop.f32.mrb[7].mxu1  ;;  %v1028_v41 = vld [vmem:[#allocation8 + $0x90] sm:$0xff] }
 0x23c   :  { %1002 = vst [vmem:[#allocation4 + $0x3] sm:$0xff] %v992_v40  ;;  %v2933_v44 = vadd.f32 %v2076_v35, %v968_v43  ;;  %v1026_v35 = vld [vmem:[#allocation8 + $0x80] sm:$0xff] }
 0x23d   :  { %v995_v45 = vmax.f32 %v2929_v42, 0.0  ;;  %v1412_v43 = vld [vmem:[#allocation8 + $0x380] sm:$0xff] }
 0x23e   :  { %v994_v47 = vmax.f32 %v2933_v44, 0.0  ;;  %v2480_v57 = vpack.c.bf16 %v1414_v46, %v1412_v43  ;;  %v1539_v46 = vld [vmem:[#allocation8 + $0x448] sm:$0xff] }
 0x23f   :  { %1005 = vst [vmem:[#allocation4 + $0x23] sm:$0xff] %v995_v45 }
 0x240   :  { %1004 = vst [vmem:[#allocation4 + $0x1b] sm:$0xff] %v994_v47 }
 0x243   :  { %v1042_v63 = vld [vmem:[#allocation4 + $0x1] sm:$0xff]  ;;  %v1043_v14 = vld [vmem:[#allocation4 + $0x9] sm:$0xff] }
 0x244   :  { %v1257_v1 = vld [vmem:[#allocation4 + $0x2] sm:$0xff]  ;;  %1144 = vmatmul.mubr.f32.vlgmr.msra.gmra.mrb[8].mxu1 %v1042_v63  ;;  %v1258_v15 = vld [vmem:[#allocation4 + $0xa] sm:$0xff] }
 0x245   :  { %1359 = vmatmul.mubr.f32.vlgmr.msra.gmra.mrb[4].mxu0 %v1257_v1  ;;  %2401 = vmatpush1.bf16.msra.mxu1 %v2400_v55  ;;  %v1419_v55 = vld [vmem:[#allocation8 + $0x3b8] sm:$0xff]  ;;  %v1418_v63 = vld [vmem:[#allocation8 + $0x3b0] sm:$0xff]  ;;  %v1035_v1 = vld [vmem:[#allocation8 + $0xc8] sm:$0xff] }
 0x246   :  { %2465 = vmatpush1.bf16.msra.mxu0 %v2464_v56  ;;  %1149 = vmatprep.mubr.f32.mxu1 %v2749_v0  ;;  %v2416_v56 = vpack.c.bf16 %v1028_v41, %v1026_v35  ;;  %v2482_v61 = vpack.c.bf16 %v1419_v55, %v1417_v52  ;;  %v1536_v41 = vld [vmem:[#allocation8 + $0x430] sm:$0xff]  ;;  %v1545_v55 = vld [vmem:[#allocation8 + $0x478] sm:$0xff] }
 0x247   :  { %2403 = vmatprep.subr.bf16.mxu1 %v2402_v59  ;;  %1364 = vmatprep.mubr.f32.mxu0 %v2749_v0  ;;  %v1044_v30 = vld [vmem:[#allocation4 + $0x19] sm:$0xff]  ;;  %v1045_v53 = vld [vmem:[#allocation4 + $0x21] sm:$0xff] }
 0x248   :  { %2467 = vmatprep.subr.bf16.mxu0 %v2466_v2  ;;  %1150 = vmatmul.mubr.f32.gmra.mrb[10].mxu1 %v1043_v14  ;;  %v1259_v31 = vld [vmem:[#allocation4 + $0x1a] sm:$0xff]  ;;  %v1260_v54 = vld [vmem:[#allocation4 + $0x22] sm:$0xff] }
 0x249   :  { %1365 = vmatmul.mubr.f32.gmra.mrb[6].mxu0 %v1258_v15  ;;  %2405 = vmatpush1.bf16.msra.mxu1 %v2404_v6  ;;  %v1032_v59 = vld [vmem:[#allocation8 + $0xb0] sm:$0xff]  ;;  %v1037_v2 = vld [vmem:[#allocation8 + $0xd8] sm:$0xff]  ;;  %v2484_v6 = vpack.c.bf16 %v1418_v63, %v1416_v62  ;;  %v1425_v15 = vld [vmem:[#allocation8 + $0x3e8] sm:$0xff] }
 0x24a   :  { %2469 = vmatpush1.bf16.msra.mxu0 %v2468_v7  ;;  %1155 = vmatprep.mubr.f32.mxu1 %v2749_v0  ;;  %v2420_v5 = vpack.c.bf16 %v1032_v59, %v1030_v58  ;;  %v1034_v7 = vld [vmem:[#allocation8 + $0xc0] sm:$0xff]  ;;  %v2422_v9 = vpack.c.bf16 %v1037_v2, %v1035_v1  ;;  %v1041_v14 = vld [vmem:[#allocation8 + $0xf8] sm:$0xff]  ;;  %v1006_v43 = vld [vmem:[#allocation4] sm:$0xff] }
 0x24b   :  { %2407 = vmatprep.subr.bf16.mxu1 %v2406_v10  ;;  %1370 = vmatprep.mubr.f32.mxu0 %v2749_v0  ;;  %v2486_v10 = vpack.c.bf16 %v1423_v4, %v1421_v3  ;;  %v2424_v17 = vpack.c.bf16 %v1036_v8, %v1034_v7  ;;  %v2426_v20 = vpack.c.bf16 %v1041_v14, %v1039_v13  ;;  %v1540_v52 = vld [vmem:[#allocation8 + $0x450] sm:$0xff]  ;;  %v1008_v58 = vld [vmem:[#allocation4 + $0x18] sm:$0xff]  ;;  %v1553_v2 = vld [vmem:[#allocation8 + $0x4b8] sm:$0xff] }
 0x24c   :  { %2471 = vmatprep.subr.bf16.mxu0 %v2470_v16  ;;  %1156 = vmatmul.mubr.f32.gmra.mrb[12].mxu1 %v1044_v30  ;;  %v1427_v16 = vld [vmem:[#allocation8 + $0x3f8] sm:$0xff]  ;;  %v1530_v30 = vld [vmem:[#allocation8 + $0x400] sm:$0xff]  ;;  %v2504_v39 = vpack.c.bf16 %v1540_v52, %v1538_v51  ;;  %v1547_v59 = vld [vmem:[#allocation8 + $0x488] sm:$0xff] }
 0x24d   :  { %1371 = vmatmul.mubr.f32.gmra.mrb[8].mxu0 %v1259_v31  ;;  %2409 = vmatpush1.bf16.msra.mxu1 %v2408_v21  ;;  %v2490_v21 = vpack.c.bf16 %v1427_v16, %v1425_v15  ;;  %v1532_v31 = vld [vmem:[#allocation8 + $0x410] sm:$0xff]  ;;  %v1551_v1 = vld [vmem:[#allocation8 + $0x4a8] sm:$0xff]  ;;  %v1550_v3 = vld [vmem:[#allocation8 + $0x4a0] sm:$0xff] }
 0x24e   :  { %2473 = vmatpush1.bf16.msra.mxu0 %v2472_v22  ;;  %1161 = vmatprep.mubr.f32.mxu1 %v2749_v0  ;;  %v1040_v22 = vld [vmem:[#allocation8 + $0xf0] sm:$0xff]  ;;  %v2496_v35 = vpack.c.bf16 %v1532_v31, %v1530_v30  ;;  %v1558_v13 = vld [vmem:[#allocation8 + $0x4e0] sm:$0xff]  ;;  %v1665_v15 = vld [vmem:[#allocation8 + $0x508] sm:$0xff] }
 0x24f   :  { %2411 = vmatprep.subr.bf16.mxu1 %v2410_v26  ;;  %1376 = vmatprep.mubr.f32.mxu0 %v2749_v0  ;;  %v1533_v26 = vld [vmem:[#allocation8 + $0x418] sm:$0xff]  ;;  %v2428_v27 = vpack.c.bf16 %v1040_v22, %v1038_v19  ;;  %v1548_v62 = vld [vmem:[#allocation8 + $0x490] sm:$0xff]  ;;  %v1664_v19 = vld [vmem:[#allocation8 + $0x500] sm:$0xff] }
 0x250   :  { %2475 = vmatprep.subr.bf16.mxu0 %v2474_v32  ;;  %1162 = vmatmul.mubr.f32.gmra.mrb[14].mxu1 %v1045_v53  ;;  %v2494_v29 = vpack.c.bf16 %v1533_v26, %v1531_v25  ;;  %v1535_v32 = vld [vmem:[#allocation8 + $0x428] sm:$0xff]  ;;  %v1007_v53 = vld [vmem:[#allocation4 + $0x8] sm:$0xff]  ;;  %v1009_v63 = vld [vmem:[#allocation4 + $0x20] sm:$0xff] }
 0x251   :  { %1377 = vmatmul.mubr.f32.gmra.mrb[10].mxu0 %v1260_v54  ;;  %2413 = vmatpush1.bf16.msra.mxu1 %v2412_v36  ;;  %v2498_v36 = vpack.c.bf16 %v1537_v33, %v1535_v32  ;;  %v1543_v54 = vld [vmem:[#allocation8 + $0x468] sm:$0xff]  ;;  %v1552_v4 = vld [vmem:[#allocation8 + $0x4b0] sm:$0xff]  ;;  %v1667_v16 = vld [vmem:[#allocation8 + $0x518] sm:$0xff] }
 0x252   :  { %2477 = vmatpush1.bf16.msra.mxu0 %v2476_v38  ;;  %2415 = vmatprep.subr.bf16.mxu1 %v2414_v48  ;;  %v1534_v38 = vld [vmem:[#allocation8 + $0x420] sm:$0xff]  ;;  %v1541_v48 = vld [vmem:[#allocation8 + $0x458] sm:$0xff]  ;;  %v2516_v7 = vpack.c.bf16 %v1552_v4, %v1550_v3  ;;  %v1560_v14 = vld [vmem:[#allocation8 + $0x4f0] sm:$0xff] }
 0x253   :  { %2479 = vmatprep.subr.bf16.mxu0 %v2478_v49  ;;  %1232 = vmatprep.mubr.f32.mxu1 %v2749_v0  ;;  %v2500_v49 = vpack.c.bf16 %v1536_v41, %v1534_v38  ;;  %v2502_v50 = vpack.c.bf16 %v1541_v48, %v1539_v46  ;;  %v1671_v22 = vld [vmem:[#allocation8 + $0x538] sm:$0xff]  ;;  %v1668_v25 = vld [vmem:[#allocation8 + $0x520] sm:$0xff]  ;;  %v1670_v26 = vld [vmem:[#allocation8 + $0x530] sm:$0xff] }
 0x254   :  { %1492 = vmatprep.mubr.f32.mxu0 %v2749_v0  ;;  %v2532_v30 = vpack.c.bf16 %v1670_v26, %v1668_v25  ;;  %v1672_v32 = vld [vmem:[#allocation8 + $0x540] sm:$0xff]  ;;  %v1674_v33 = vld [vmem:[#allocation8 + $0x550] sm:$0xff]  ;;  %v1679_v38 = vld [vmem:[#allocation8 + $0x578] sm:$0xff] }
 0x255   :  { %2417 = vmatpush1.bf16.msra.mxu1 %v2416_v56  ;;  %v1542_v56 = vld [vmem:[#allocation8 + $0x460] sm:$0xff]  ;;  %v2536_v41 = vpack.c.bf16 %v1674_v33, %v1672_v32  ;;  %v1678_v48 = vld [vmem:[#allocation8 + $0x570] sm:$0xff]  ;;  %v1683_v51 = vld [vmem:[#allocation8 + $0x598] sm:$0xff] }
 0x256   :  { %2481 = vmatpush1.bf16.msra.mxu0 %v2480_v57  ;;  %2419 = vmatprep.subr.bf16.mxu1 %v2418_v60  ;;  %v1544_v57 = vld [vmem:[#allocation8 + $0x470] sm:$0xff]  ;;  %v1549_v60 = vld [vmem:[#allocation8 + $0x498] sm:$0xff]  ;;  %v1676_v46 = vld [vmem:[#allocation8 + $0x560] sm:$0xff] }
 0x257   :  { %2483 = vmatprep.subr.bf16.mxu0 %v2482_v61  ;;  %v2508_v37 = vpack.c.bf16 %v1544_v57, %v1542_v56  ;;  %v1546_v61 = vld [vmem:[#allocation8 + $0x480] sm:$0xff]  ;;  %v2540_v52 = vpack.c.bf16 %v1678_v48, %v1676_v46  ;;  %v1687_v56 = vld [vmem:[#allocation8 + $0x5b8] sm:$0xff] }
 0x258   :  { %v2512_v44 = vpack.c.bf16 %v1548_v62, %v1546_v61  ;;  %v1692_v4 = vld [vmem:[#allocation8 + $0x5e0] sm:$0xff]  ;;  %v1813_v25 = vld [vmem:[#allocation8 + $0x678] sm:$0xff] }
 0x259   :  { %2421 = vmatpush1.bf16.msra.mxu1 %v2420_v5  ;;  %v1555_v5 = vld [vmem:[#allocation8 + $0x4c8] sm:$0xff]  ;;  %v1817_v32 = vld [vmem:[#allocation8 + $0x698] sm:$0xff] }
 0x25a   :  { %2485 = vmatpush1.bf16.msra.mxu0 %v2484_v6  ;;  %2423 = vmatprep.subr.bf16.mxu1 %v2422_v9  ;;  %v1557_v6 = vld [vmem:[#allocation8 + $0x4d8] sm:$0xff]  ;;  %v1554_v9 = vld [vmem:[#allocation8 + $0x4c0] sm:$0xff] }
 0x25b   :  { %2487 = vmatprep.subr.bf16.mxu0 %v2486_v10  ;;  %v2518_v8 = vpack.c.bf16 %v1557_v6, %v1555_v5  ;;  %v1556_v10 = vld [vmem:[#allocation8 + $0x4d0] sm:$0xff]  ;;  %v1799_v6 = vld [vmem:[#allocation8 + $0x608] sm:$0xff]  ;;  %v1821_v46 = vld [vmem:[#allocation8 + $0x6b8] sm:$0xff] }
 0x25c   :  { %v2520_v42 = vpack.c.bf16 %v1556_v10, %v1554_v9  ;;  %v1694_v5 = vld [vmem:[#allocation8 + $0x5f0] sm:$0xff]  ;;  %v1798_v10 = vld [vmem:[#allocation8 + $0x600] sm:$0xff] }
 0x25d   :  { %2425 = vmatpush1.bf16.msra.mxu1 %v2424_v17  ;;  %v2524_v17 = vpack.c.bf16 %v1560_v14, %v1558_v13  ;;  %v1802_v14 = vld [vmem:[#allocation8 + $0x620] sm:$0xff] }
 0x25e   :  { %2489 = vmatpush1.bf16.msra.mxu0 %v2488_v18  ;;  %2427 = vmatprep.subr.bf16.mxu1 %v2426_v20  ;;  %v2526_v18 = vpack.c.bf16 %v1667_v16, %v1665_v15  ;;  %v1666_v20 = vld [vmem:[#allocation8 + $0x510] sm:$0xff] }
 0x25f   :  { %2491 = vmatprep.subr.bf16.mxu0 %v2490_v21  ;;  %v1669_v21 = vld [vmem:[#allocation8 + $0x528] sm:$0xff]  ;;  %v2528_v23 = vpack.c.bf16 %v1666_v20, %v1664_v19  ;;  %v1804_v15 = vld [vmem:[#allocation8 + $0x630] sm:$0xff] }
 0x260   :  { %v2530_v24 = vpack.c.bf16 %v1671_v22, %v1669_v21  ;;  %v1659_v16 = vld [vmem:[#allocation4 + $0x5] sm:$0xff]  ;;  %v2564_v19 = vpack.c.bf16 %v1804_v15, %v1802_v14  ;;  %v1806_v21 = vld [vmem:[#allocation8 + $0x640] sm:$0xff] }
 0x261   :  { %2429 = vmatpush1.bf16.msra.mxu1 %v2428_v27  ;;  %v1525_v27 = vld [vmem:[#allocation4 + $0x4] sm:$0xff] }
 0x262   :  { %2493 = vmatpush1.bf16.msra.mxu0 %v2492_v28  ;;  %v1673_v28 = vld [vmem:[#allocation8 + $0x548] sm:$0xff]  ;;  %v1808_v22 = vld [vmem:[#allocation8 + $0x650] sm:$0xff] }
 0x263   :  { %2495 = vmatprep.subr.bf16.mxu0 %v2494_v29  ;;  %v1675_v29 = vld [vmem:[#allocation8 + $0x558] sm:$0xff]  ;;  %v2568_v26 = vpack.c.bf16 %v1808_v22, %v1806_v21 }
 0x264   :  { %1233 = vmatmul.mubr.f32.vlgmr.msra.gmra.mrb[8].mxu1 %v1006_v43  ;;  %v2534_v31 = vpack.c.bf16 %v1675_v29, %v1673_v28  ;;  %v1810_v28 = vld [vmem:[#allocation8 + $0x660] sm:$0xff]  ;;  %v1812_v29 = vld [vmem:[#allocation8 + $0x670] sm:$0xff] }
 0x265   :  { %1493 = vmatmul.mubr.f32.vlgmr.msra.gmra.mrb[4].mxu0 %v992_v40  ;;  %1238 = vmatprep.mubr.f32.mxu1 %v2749_v0  ;;  %v2506_v40 = vpack.c.bf16 %v1545_v55, %v1543_v54  ;;  %v1680_v54 = vld [vmem:[#allocation8 + $0x580] sm:$0xff]  ;;  %v1682_v55 = vld [vmem:[#allocation8 + $0x590] sm:$0xff]  ;;  %v2572_v33 = vpack.c.bf16 %v1812_v29, %v1810_v28 }
 0x266   :  { %2497 = vmatpush1.bf16.msra.mxu0 %v2496_v35  ;;  %1498 = vmatprep.mubr.f32.mxu0 %v2749_v0  ;;  %v1526_v35 = vld [vmem:[#allocation4 + $0xc] sm:$0xff]  ;;  %v2544_v57 = vpack.c.bf16 %v1682_v55, %v1680_v54 }
 0x267   :  { %2499 = vmatprep.subr.bf16.mxu0 %v2498_v36  ;;  %v1677_v36 = vld [vmem:[#allocation8 + $0x568] sm:$0xff] }
 0x268   :  { %1239 = vmatmul.mubr.f32.gmra.mrb[10].mxu1 %v1007_v53  ;;  %v2538_v43 = vpack.c.bf16 %v1679_v38, %v1677_v36  ;;  %v1814_v36 = vld [vmem:[#allocation8 + $0x680] sm:$0xff]  ;;  %v1816_v38 = vld [vmem:[#allocation8 + $0x690] sm:$0xff] }
 0x269   :  { %1499 = vmatmul.mubr.f32.gmra.mrb[6].mxu0 %v993_v34  ;;  %1244 = vmatprep.mubr.f32.mxu1 %v2749_v0  ;;  %v2510_v34 = vpack.c.bf16 %v1549_v60, %v1547_v59  ;;  %v1684_v59 = vld [vmem:[#allocation8 + $0x5a0] sm:$0xff]  ;;  %v1686_v60 = vld [vmem:[#allocation8 + $0x5b0] sm:$0xff]  ;;  %v2576_v48 = vpack.c.bf16 %v1816_v38, %v1814_v36 }
 0x26a   :  { %2501 = vmatpush1.bf16.msra.mxu0 %v2500_v49  ;;  %1504 = vmatprep.mubr.f32.mxu0 %v2749_v0  ;;  %v1527_v49 = vld [vmem:[#allocation4 + $0x1c] sm:$0xff]  ;;  %v2548_v61 = vpack.c.bf16 %v1686_v60, %v1684_v59  ;;  %v1826_v60 = vld [vmem:[#allocation8 + $0x6e0] sm:$0xff] }
 0x26b   :  { %2503 = vmatprep.subr.bf16.mxu0 %v2502_v50  ;;  %v1681_v50 = vld [vmem:[#allocation8 + $0x588] sm:$0xff] }
 0x26c   :  { %1245 = vmatmul.mubr.f32.gmra.mrb[12].mxu1 %v1008_v58  ;;  %v2542_v53 = vpack.c.bf16 %v1683_v51, %v1681_v50  ;;  %v1818_v50 = vld [vmem:[#allocation8 + $0x6a0] sm:$0xff]  ;;  %v1820_v51 = vld [vmem:[#allocation8 + $0x6b0] sm:$0xff] }
 0x26d   :  { %1505 = vmatmul.mubr.f32.gmra.mrb[8].mxu0 %v994_v47  ;;  %1250 = vmatprep.mubr.f32.mxu1 %v2749_v0  ;;  %v2514_v47 = vpack.c.bf16 %v1553_v2, %v1551_v1  ;;  %v1690_v1 = vld [vmem:[#allocation8 + $0x5d0] sm:$0xff]  ;;  %v1693_v2 = vld [vmem:[#allocation8 + $0x5e8] sm:$0xff]  ;;  %v2580_v54 = vpack.c.bf16 %v1820_v51, %v1818_v50 }
 0x26e   :  { %2505 = vmatpush1.bf16.msra.mxu0 %v2504_v39  ;;  %1510 = vmatprep.mubr.f32.mxu0 %v2749_v0  ;;  %v1528_v39 = vld [vmem:[#allocation4 + $0x24] sm:$0xff] }
 0x26f   :  { %2507 = vmatprep.subr.bf16.mxu0 %v2506_v40  ;;  %v1685_v40 = vld [vmem:[#allocation8 + $0x5a8] sm:$0xff] }
 0x270   :  { %1251 = vmatmul.mubr.f32.gmra.mrb[14].mxu1 %v1009_v63  ;;  %v2546_v58 = vpack.c.bf16 %v1687_v56, %v1685_v40  ;;  %v1688_v63 = vld [vmem:[#allocation8 + $0x5c0] sm:$0xff]  ;;  %v1824_v40 = vld [vmem:[#allocation8 + $0x6d0] sm:$0xff]  ;;  %v1827_v56 = vld [vmem:[#allocation8 + $0x6e8] sm:$0xff] }
 0x271   :  { %1511 = vmatmul.mubr.f32.gmra.mrb[10].mxu0 %v995_v45  ;;  %v2522_v45 = vpack.c.bf16 %v1561_v12, %v1559_v11  ;;  %v1800_v11 = vld [vmem:[#allocation8 + $0x610] sm:$0xff]  ;;  %v1803_v12 = vld [vmem:[#allocation8 + $0x628] sm:$0xff] }
 0x272   :  { %2509 = vmatpush1.bf16.msra.mxu0 %v2508_v37  ;;  %1626 = vmatprep.mubr.f32.mxu0 %v2749_v0  ;;  %v1689_v37 = vld [vmem:[#allocation8 + $0x5c8] sm:$0xff] }
 0x273   :  { %2511 = vmatprep.subr.bf16.mxu0 %v2510_v34  ;;  %v1691_v34 = vld [vmem:[#allocation8 + $0x5d8] sm:$0xff] }
 0x274   :  { %v2550_v62 = vpack.c.bf16 %v1691_v34, %v1689_v37  ;;  %v1828_v37 = vld [vmem:[#allocation8 + $0x6f0] sm:$0xff] }
 0x275   :  { %v2588_v34 = vpack.c.bf16 %v1828_v37, %v1826_v60 }
 0x276   :  { %2513 = vmatpush1.bf16.msra.mxu0 %v2512_v44  ;;  %v1695_v44 = vld [vmem:[#allocation8 + $0x5f8] sm:$0xff] }
 0x277   :  { %2515 = vmatprep.subr.bf16.mxu0 %v2514_v47  ;;  %v2552_v47 = vpack.c.bf16 %v1690_v1, %v1688_v63  ;;  %v2554_v3 = vpack.c.bf16 %v1695_v44, %v1693_v2  ;;  %v1795_v63 = vld [vmem:[#allocation4 + $0x1e] sm:$0xff]  ;;  %v1796_v1 = vld [vmem:[#allocation4 + $0x26] sm:$0xff] }
 0x27a   :  { %2517 = vmatpush1.bf16.msra.mxu0 %v2516_v7  ;;  %v1801_v7 = vld [vmem:[#allocation8 + $0x618] sm:$0xff] }
 0x27b   :  { %2519 = vmatprep.subr.bf16.mxu0 %v2518_v8  ;;  %v2556_v8 = vpack.c.bf16 %v1694_v5, %v1692_v4  ;;  %v2558_v9 = vpack.c.bf16 %v1801_v7, %v1799_v6 }
 0x27e   :  { %2521 = vmatpush1.bf16.msra.mxu0 %v2520_v42  ;;  %v1805_v42 = vld [vmem:[#allocation8 + $0x638] sm:$0xff] }
 0x27f   :  { %2523 = vmatprep.subr.bf16.mxu0 %v2522_v45  ;;  %v2560_v45 = vpack.c.bf16 %v1800_v11, %v1798_v10  ;;  %v2562_v13 = vpack.c.bf16 %v1805_v42, %v1803_v12  ;;  %v1927_v11 = vld [vmem:[%s3001_s6] sm:$0x3]  ;;  %s2751_s6 = smov [#allocation10]  }
 0x280   :  { %s2028_s20 = sshll.u32 %s2751_s6, 4  ;;  %s2029_s20 = int_to_ptr.vmem [resolvable:$true] %s2028_s20 }
 0x281   :  { %s2715_s21 = scalar_lea.vmem %s2029_s20, 64  ;;  %p2720_p3 = scmp.lt.s32.totalorder %s2029_s20, %s2029_s20 }
 0x282   :  { %2525 = vmatpush1.bf16.msra.mxu0 %v2524_v17  ;;  %v1807_v17 = vld [vmem:[#allocation8 + $0x648] sm:$0xff]  ;;  %p2716_p2 = scmp.ne.s32.totalorder %s2029_s20, %s2715_s21  ;;  %p2721_p4 = scmp.lt.s32.totalorder %s2715_s21, %s2715_s21 }
 0x283   :  { %2527 = vmatprep.subr.bf16.mxu0 %v2526_v18  ;;  %v1809_v18 = vld [vmem:[#allocation8 + $0x658] sm:$0xff] }
 0x284   :  { %v2566_v20 = vpack.c.bf16 %v1809_v18, %v1807_v17  ;;  %p2722_p5 = por %p2721_p4, %p2720_p3 }
 0x285   :  { %1627 = vmatmul.mubr.f32.vlgmr.msra.gmra.mrb[4].mxu0 %v1525_v27 }
 0x286   :  { %2529 = vmatpush1.bf16.msra.mxu0 %v2528_v23  ;;  %1632 = vmatprep.mubr.f32.mxu0 %v2749_v0  ;;  %v1660_v23 = vld [vmem:[#allocation4 + $0xd] sm:$0xff]  ;;  %p2723_p6 = pnand %p2722_p5, %p2716_p2 }
 0x287   :  { %2531 = vmatprep.subr.bf16.mxu0 %v2530_v24  ;;  %v1811_v24 = vld [vmem:[#allocation8 + $0x668] sm:$0xff] }
 0x288   :  { %v2570_v27 = vpack.c.bf16 %v1813_v25, %v1811_v24 }
 0x289   :  { %1633 = vmatmul.mubr.f32.gmra.mrb[6].mxu0 %v1526_v35 }
 0x28a   :  { %2533 = vmatpush1.bf16.msra.mxu0 %v2532_v30  ;;  %1638 = vmatprep.mubr.f32.mxu0 %v2749_v0  ;;  %v1661_v30 = vld [vmem:[#allocation4 + $0x1d] sm:$0xff] }
 0x28b   :  { %2535 = vmatprep.subr.bf16.mxu0 %v2534_v31  ;;  %v1815_v31 = vld [vmem:[#allocation8 + $0x688] sm:$0xff] }
 0x28c   :  { %v2574_v35 = vpack.c.bf16 %v1817_v32, %v1815_v31 }
 0x28d   :  { %1639 = vmatmul.mubr.f32.gmra.mrb[8].mxu0 %v1527_v49 }
 0x28e   :  { %2537 = vmatpush1.bf16.msra.mxu0 %v2536_v41  ;;  %1644 = vmatprep.mubr.f32.mxu0 %v2749_v0  ;;  %v1662_v41 = vld [vmem:[#allocation4 + $0x25] sm:$0xff] }
 0x28f   :  { %2539 = vmatprep.subr.bf16.mxu0 %v2538_v43  ;;  %v1819_v43 = vld [vmem:[#allocation8 + $0x6a8] sm:$0xff] }
 0x290   :  { %v2578_v49 = vpack.c.bf16 %v1821_v46, %v1819_v43 }
 0x291   :  { %1645 = vmatmul.mubr.f32.gmra.mrb[10].mxu0 %v1528_v39  ;;  %v1822_v39 = vld [vmem:[#allocation8 + $0x6c0] sm:$0xff] }
 0x292   :  { %2541 = vmatpush1.bf16.msra.mxu0 %v2540_v52  ;;  %1760 = vmatprep.mubr.f32.mxu0 %v2749_v0  ;;  %v1823_v52 = vld [vmem:[#allocation8 + $0x6c8] sm:$0xff] }
 0x293   :  { %2543 = vmatprep.subr.bf16.mxu0 %v2542_v53  ;;  %v1825_v53 = vld [vmem:[#allocation8 + $0x6d8] sm:$0xff] }
 0x294   :  { %v2582_v55 = vpack.c.bf16 %v1825_v53, %v1823_v52 }
 0x296   :  { %2545 = vmatpush1.bf16.msra.mxu0 %v2544_v57  ;;  %v1829_v57 = vld [vmem:[#allocation8 + $0x6f8] sm:$0xff] }
 0x297   :  { %2547 = vmatprep.subr.bf16.mxu0 %v2546_v58  ;;  %v2584_v58 = vpack.c.bf16 %v1824_v40, %v1822_v39  ;;  %v2586_v59 = vpack.c.bf16 %v1829_v57, %v1827_v56 }
 0x29a   :  { %2549 = vmatpush1.bf16.msra.mxu0 %v2548_v61  ;;  %v1793_v61 = vld [vmem:[#allocation4 + $0x6] sm:$0xff] }
 0x29b   :  { %2551 = vmatprep.subr.bf16.mxu0 %v2550_v62  ;;  %v1794_v62 = vld [vmem:[#allocation4 + $0xe] sm:$0xff] }
 0x29e   :  { %2553 = vmatpush1.bf16.msra.mxu0 %v2552_v47 }
 0x29f   :  { %2555 = vmatprep.subr.bf16.mxu0 %v2554_v3 }
 0x2a2   :  { %2557 = vmatpush1.bf16.msra.mxu0 %v2556_v8  ;;  %v1929_v8 = vlaneseq }
 0x2a3   :  { %2559 = vmatprep.subr.bf16.mxu0 %v2558_v9 }
 0x2a4   :  { %v2975_v9 = vshrl.u32 %v1929_v8, 7 }
 0x2a5   :  { %1761 = vmatmul.mubr.f32.vlgmr.msra.gmra.mrb[4].mxu0 %v1659_v16 }
 0x2a6   :  { %2561 = vmatpush1.bf16.msra.mxu0 %v2560_v45  ;;  %1766 = vmatprep.mubr.f32.mxu0 %v2749_v0  ;;  %v1931_v10 = vsub.s32 0, %v2975_v9 }
 0x2a7   :  { %2563 = vmatprep.subr.bf16.mxu0 %v2562_v13 }
 0x2a8   :  { %v1932_v45 = vrot.slane %v1927_v11, %v1931_v10 }
 0x2a9   :  { %1767 = vmatmul.mubr.f32.gmra.mrb[6].mxu0 %v1660_v23 }
 0x2aa   :  { %2565 = vmatpush1.bf16.msra.mxu0 %v2564_v19  ;;  %1772 = vmatprep.mubr.f32.mxu0 %v2749_v0 }
 0x2ab   :  { %2567 = vmatprep.subr.bf16.mxu0 %v2566_v20 }
 0x2ad   :  { %1773 = vmatmul.mubr.f32.gmra.mrb[8].mxu0 %v1661_v30 }
 0x2ae   :  { %2569 = vmatpush1.bf16.msra.mxu0 %v2568_v26  ;;  %1778 = vmatprep.mubr.f32.mxu0 %v2749_v0 }
 0x2af   :  { %2571 = vmatprep.subr.bf16.mxu0 %v2570_v27 }
 0x2b1   :  { %1779 = vmatmul.mubr.f32.gmra.mrb[10].mxu0 %v1662_v41 }
 0x2b2   :  { %2573 = vmatpush1.bf16.msra.mxu0 %v2572_v33  ;;  %1894 = vmatprep.mubr.f32.mxu0 %v2749_v0 }
 0x2b3   :  { %2575 = vmatprep.subr.bf16.mxu0 %v2574_v35 }
 0x2b6   :  { %2577 = vmatpush1.bf16.msra.mxu0 %v2576_v48 }
 0x2b7   :  { %2579 = vmatprep.subr.bf16.mxu0 %v2578_v49 }
 0x2ba   :  { %2581 = vmatpush1.bf16.msra.mxu0 %v2580_v54 }
 0x2bb   :  { %2583 = vmatprep.subr.bf16.mxu0 %v2582_v55 }
 0x2be   :  { %2585 = vmatpush1.bf16.msra.mxu0 %v2584_v58 }
 0x2bf   :  { %2587 = vmatprep.subr.bf16.mxu0 %v2586_v59 }
 0x2c2   :  { %2589 = vmatpush1.bf16.msra.mxu0 %v2588_v34 }
 0x2c5   :  { %1895 = vmatmul.mubr.f32.vlgmr.msra.gmra.mrb[4].mxu0 %v1793_v61 }
 0x2c6   :  { %1900 = vmatprep.mubr.f32.mxu0 %v2749_v0 }
 0x2c9   :  { %1901 = vmatmul.mubr.f32.gmra.mrb[6].mxu0 %v1794_v62 }
 0x2ca   :  { %1906 = vmatprep.mubr.f32.mxu0 %v2749_v0 }
 0x2cd   :  { %1907 = vmatmul.mubr.f32.gmra.mrb[8].mxu0 %v1795_v63 }
 0x2ce   :  { %1912 = vmatprep.mubr.f32.mxu0 %v2749_v0  ;;  %v1935_v0 = vsub.s32 1, %v2975_v9 }
 0x2d0   :  { %v1936_v15 = vrot.slane %v1927_v11, %v1935_v0  ;;  %v2750_v11 = vmov 1983009808  }
 0x2d1   :  { %1913 = vmatmul.mubr.f32.gmra.mrb[10].mxu0 %v1796_v1  ;;  %v1993_v0 = vunpack.c.l.s4 %v2750_v11 }
 0x337   :  { %v1234_v2 = vpop.f32.mrb[8].mxu1 }
 0x338   :  { %v1236_v44 = vpop.f32.mrb[9].mxu1 }
 0x33b   :  { %v1240_v47 = vpop.f32.mrb[10].mxu1 }
 0x33c   :  { %v1242_v3 = vpop.f32.mrb[11].mxu1 }
 0x33f   :  { %v1246_v4 = vpop.f32.mrb[12].mxu1 }
 0x340   :  { %v1248_v5 = vpop.f32.mrb[13].mxu1 }
 0x343   :  { %v1252_v6 = vpop.f32.mrb[14].mxu1 }
 0x344   :  { %v1254_v7 = vpop.f32.mrb[15].mxu1 }
 0x398   :  { %v1896_v12 = vpop.f32.mrb[4].mxu0 }
 0x399   :  { %v2594_v42 = vadd.f32 %v1896_v12, %v1234_v2  ;;  %v1898_v13 = vpop.f32.mrb[5].mxu0 }
 0x39a   :  { %v2595_v14 = vadd.f32 %v1898_v13, %v1236_v44 }
 0x39b   :  { %v1939_v17 = vadd.f32 %v2594_v42, %v1932_v45 }
 0x39c   :  { %v1902_v16 = vpop.f32.mrb[6].mxu0  ;;  %v1940_v20 = vadd.f32 %v2595_v14, %v1936_v15  ;;  %v1994_v14 = vunpack.c.0.s8 %v1993_v0 }
 0x39d   :  { %v2596_v18 = vadd.f32 %v1902_v16, %v1240_v47  ;;  %v1904_v19 = vpop.f32.mrb[7].mxu0  ;;  %v1947_v25 = vmax.f32 %v1939_v17, 0.0 }
 0x39e   :  { %v2597_v21 = vadd.f32 %v1904_v19, %v1242_v3  ;;  %v1948_v29 = vmax.f32 %v1940_v20, 0.0  ;;  %v1997_v17 = vsub.s32 %v1994_v14, %v2975_v9 }
 0x39f   :  { %v1941_v22 = vadd.f32 %v2596_v18, %v1932_v45 }
 0x3a0   :  { %v1942_v23 = vadd.f32 %v2597_v21, %v1936_v15  ;;  %v1908_v24 = vpop.f32.mrb[8].mxu0 }
 0x3a1   :  { %v1949_v26 = vmax.f32 %v1941_v22, 0.0  ;;  %v2598_v27 = vadd.f32 %v1908_v24, %v1246_v4  ;;  %v1910_v28 = vpop.f32.mrb[9].mxu0 }
 0x3a2   :  { %v1950_v30 = vmax.f32 %v1942_v23, 0.0  ;;  %v2599_v31 = vadd.f32 %v1910_v28, %v1248_v5 }
 0x3a3   :  { %v1955_v32 = vadd.f32 %v1949_v26, %v1947_v25  ;;  %v1943_v38 = vadd.f32 %v2598_v27, %v1932_v45 }
 0x3a4   :  { %v1962_v33 = vadd.f32 %v1950_v30, %v1948_v29  ;;  %v1914_v35 = vpop.f32.mrb[10].mxu0  ;;  %v1944_v48 = vadd.f32 %v2599_v31, %v1936_v15 }
 0x3a5   :  { %v1956_v36 = vrot.slane %v1955_v32, 4  ;;  %v2600_v41 = vadd.f32 %v1914_v35, %v1252_v6  ;;  %v1916_v43 = vpop.f32.mrb[11].mxu0  ;;  %v1951_v55 = vmax.f32 %v1943_v38, 0.0 }
 0x3a6   :  { %v1963_v46 = vrot.slane %v1962_v33, 4  ;;  %v2601_v49 = vadd.f32 %v1916_v43, %v1254_v7  ;;  %v1952_v56 = vmax.f32 %v1944_v48, 0.0 }
 0x3a7   :  { %v1957_v50 = vadd.f32 %v1956_v36, %v1955_v32  ;;  %v1945_v51 = vadd.f32 %v2600_v41, %v1932_v45 }
 0x3a8   :  { %v1964_v52 = vadd.f32 %v1963_v46, %v1962_v33  ;;  %v1946_v53 = vadd.f32 %v2601_v49, %v1936_v15 }
 0x3a9   :  { %v1958_v54 = vrot.slane %v1957_v50, 2  ;;  %v1953_v39 = vmax.f32 %v1945_v51, 0.0 }
 0x3aa   :  { %v1965_v40 = vrot.slane %v1964_v52, 2  ;;  %v1954_v57 = vmax.f32 %v1946_v53, 0.0 }
 0x3ab   :  { %v1959_v58 = vadd.f32 %v1958_v54, %v1957_v50  ;;  %v1969_v59 = vadd.f32 %v1953_v39, %v1951_v55 }
 0x3ac   :  { %v1966_v60 = vadd.f32 %v1965_v40, %v1964_v52  ;;  %v1976_v37 = vadd.f32 %v1954_v57, %v1952_v56 }
 0x3ad   :  { %v1960_v34 = vrot.slane %v1959_v58, 1  ;;  %v1970_v61 = vrot.slane %v1969_v59, 4 }
 0x3ae   :  { %v1967_v62 = vrot.slane %v1966_v60, 1  ;;  %v1977_v63 = vrot.slane %v1976_v37, 4 }
 0x3af   :  { %v1961_v1 = vadd.f32 %v1960_v34, %v1959_v58  ;;  %v1971_v2 = vadd.f32 %v1970_v61, %v1969_v59 }
 0x3b0   :  { %v1968_v44 = vadd.f32 %v1967_v62, %v1966_v60  ;;  %v1978_v47 = vadd.f32 %v1977_v63, %v1976_v37 }
 0x3b1   :  { %v1983_v3 = vmul.f32 0.0625, %v1961_v1  ;;  %v1972_v4 = vrot.slane %v1971_v2, 2 }
 0x3b2   :  { %v1984_v5 = vmul.f32 0.0625, %v1968_v44  ;;  %v1979_v6 = vrot.slane %v1978_v47, 2 }
 0x3b3   :  { %v1973_v7 = vadd.f32 %v1972_v4, %v1971_v2 }
 0x3b4   :  { %v1991_v8 = vcombine.low %v1983_v3, %v1984_v5  ;;  %v1980_v10 = vadd.f32 %v1979_v6, %v1978_v47 }
 0x3b5   :  { %v1974_v12 = vrot.slane %v1973_v7, 1 }
 0x3b6   :  { %v1981_v42 = vrot.slane %v1980_v10, 1  ;;  %v1998_v20 = vrot.slane %v1991_v8, %v1997_v17 }
 0x3b7   :  { %v1975_v45 = vadd.f32 %v1974_v12, %v1973_v7 }
 0x3b8   :  { %v1982_v13 = vadd.f32 %v1981_v42, %v1980_v10 }
 0x3b9   :  { %v1985_v15 = vmul.f32 0.0625, %v1975_v45 }
 0x3ba   :  { %v1986_v16 = vmul.f32 0.0625, %v1982_v13 }
 0x3bc   :  { %v1999_v18 = vcombine.low %v1985_v15, %v1986_v16 }
 0x3be   :  { %v2006_v19 = vrot.slane %v1999_v18, %v1997_v17 }
 0x3c0   :  { %v2011_v21 = vrot.slane %v2006_v19, 7 }
 0x3c2   :  { %v2013_v22 = vsel %vm2012_vm5, %v2011_v21, %v1998_v20 }
 0x3c3   :  { %v2015_v23 = vsel %vm2014_vm6, %v2011_v21, %v2013_v22 }
 0x3c4   :  { %v2017_v24 = vsel %vm2016_vm7, %v2011_v21, %v2015_v23 }
 0x3c5   :  { %v2019_v25 = vsel %vm2018_vm8, %v2011_v21, %v2017_v24 }
 0x3c6   :  { %2021 = vst [vmem:[#allocation10] sm:$0xf] %v2019_v25 }
 0x3c7   :  { %2726 = shalt.err (!%p2723_p6)
}
 0x3c8   :  { %s2727_s24 = scalar_lea.hbm %s3002_s7, 64 }
 0x3c9   :  { %p2728_p7 = scmp.ne.s32.totalorder %s3002_s7, %s2727_s24  ;;  %p2731_p8 = scmp.lt.u32.totalorder %s2727_s24, %s3002_s7 }
 0x3cb   :  { %p2733_p9 = pnand %p2731_p8, %p2728_p7 }
 0x3cd   :  { %2736 = shalt.err (!%p2733_p9)
}
 0x3ce   :  { %2031 = dma.vmem_to_hbm [thread:$0]  %s2029_s20, 64, %s3002_s7, [#allocation7]  }
 0x3cf   :  { %2741 = dma.done.wait [#allocation7], 64  }
 0x3d0   :  { %2742 = vsyncadd [#allocation7], 4294967232 }
 0x3d1   :  { %2035 = vsyncpa [#allocation6], 1 }
 0x3d2   :  { %2036 = vsyncpa [#allocation9], 1 }
 0x3d3   :  { %2037 = vsyncpa [#allocation7], 1 }

</bundles_post_ra>
